<compile_context>
chip_gen: v6e
topology: v6e:2x2x1
jax: 0.10.0
libtpu: 0.0.40
codegen_flags: <defaults>
</compile_context>

<pallas_src>
import jax
import jax.numpy as jnp
from jax.experimental import pallas as pl
from jax.experimental.pallas import tpu as pltpu

# Small shapes consistent with the module structure (original module: M=320, N=256).
M = 12
N = 16
D_IN = 2 * M * N        # 384  (= 3 * 128, lane-aligned)
H1 = 8 * N              # 128  (already lane-dense)
H2 = 4 * N              # 64   (logical)
H3 = 4 * N              # 64   (logical)
H2P = 128               # padded hidden dim (lane-dense)
H3P = 128               # padded hidden dim (lane-dense)
D_OUT = 2 * N * N       # 512  (= 4 * 128, lane-dense output)

_INV_SQRT2 = 0.7071067811865476


def _gelu(x):
    # Exact (erf-based) GELU in f32, matching torch.nn.GELU() default.
    # jax.lax.erf lowers to a VPU polynomial (not one EUP op); it is free here
    # because the kernel is weight-DMA bound, not VALU bound.
    # TODO(synk): if VALU ever binds in the production tiled kernel and exact
    # torch parity is not required, switch to tanh-approx GELU (EUP tanh).
    return 0.5 * x * (1.0 + jax.lax.erf(x * _INV_SQRT2))


def _as_bf16(w):
    # Weight-only dequant (without scale; per-column scale is applied after the
    # f32 accumulate).  For bf16 weights this is a no-op.  For int8 weights the
    # convert is a cheap VPU op; the win is the 2x smaller HBM->VMEM weight DMA.
    # TODO(synk): at production sizes on v5e/v6e, quantize activations too and
    # drive a native s8 x s8 MXU matmul to avoid this convert entirely.
    if w.dtype == jnp.bfloat16:
        return w
    return w.astype(jnp.float32).astype(jnp.bfloat16)


def mlp_kernel(x_ref, w1_ref, s1_ref, b1_ref, w2_ref, b2_ref,
               w3_ref, b3_ref, w4_ref, s4_ref, b4_ref, o_ref):
    # bf16 operands on the MXU, f32 accumulation, per-column scale + bias + GELU in f32.
    x = x_ref[...]                                                  # bf16 (Bp, D_IN)
    h = _gelu(jnp.dot(x, _as_bf16(w1_ref[...]),
                      preferred_element_type=jnp.float32) * s1_ref[...] + b1_ref[...])
    h = _gelu(jnp.dot(h.astype(jnp.bfloat16), w2_ref[...],
                      preferred_element_type=jnp.float32) + b2_ref[...])
    h = _gelu(jnp.dot(h.astype(jnp.bfloat16), w3_ref[...],
                      preferred_element_type=jnp.float32) + b3_ref[...])
    o_ref[...] = (jnp.dot(h.astype(jnp.bfloat16), _as_bf16(w4_ref[...]),
                          preferred_element_type=jnp.float32) * s4_ref[...]
                  + b4_ref[...])


def mlp_pallas(x_bf16, padded_params):
    Bp = x_bf16.shape[0]
    args = (x_bf16,) + tuple(padded_params)
    vmem = pltpu.MemorySpace.VMEM
    # No grid: a single invocation, whole arrays resident in VMEM once
    # (no pointless double-buffering of the weights at a 1-step grid).
    return pl.pallas_call(
        mlp_kernel,
        out_shape=jax.ShapeDtypeStruct((Bp, D_OUT), jnp.float32),
        in_specs=[pl.BlockSpec(memory_space=vmem) for _ in args],
        out_specs=pl.BlockSpec(memory_space=vmem),
    )(*args)


def _pad_to(a, shape):
    return jnp.pad(a, [(0, t - s) for s, t in zip(a.shape, shape)])


def _quantize_per_col(w):
    # Symmetric weight-only int8 quantization, one f32 scale per output column.
    amax = jnp.max(jnp.abs(w), axis=0, keepdims=True)               # (1, fo)
    scale = jnp.maximum(amax, 1e-8) / 127.0
    q = jnp.clip(jnp.round(w / scale), -127, 127).astype(jnp.int8)
    return q, scale.astype(jnp.float32)


def _weight_mode():
    dev = jax.devices()[0]
    if dev.platform != "tpu":
        return "bf16"
    kind = dev.device_kind.lower()
    if "v7" in kind:
        # v7x MXU has no integer mode (bf16/fp8 only): int8 would force a per-
        # tile VPU dequant at production sizes, erasing the DMA saving.
        # TODO(synk): fp8 (e4m3) per-column-scaled weights on v7x.
        return "bf16"
    return "int8"   # v5e / v6e (and older): int8 MXU is native.


def prepare_params(params, mode):
    """Zero-pad 64-wide hidden dims to 128; quantize the two big weights.

    Padding with zeros preserves the forward semantics exactly (up to bf16 /
    int8 rounding): GELU(0) == 0 and zero rows/cols contribute nothing.
    w1 and w4 carry ~95% of the weight bytes, so only they are quantized
    (per-output-column scales, applied after the f32 accumulate).  Biases and
    scales stay f32 and are tiny.
    """
    w1, b1, w2, b2, w3, b3, w4, b4 = params
    w4p = _pad_to(w4, (H3P, D_OUT))                                  # zero rows
    if mode == "int8":
        w1q, s1 = _quantize_per_col(w1)                              # (D_IN,H1) i8, (1,H1) f32
        w4q, s4 = _quantize_per_col(w4p)                             # (128,D_OUT) i8, (1,D_OUT)
    else:
        w1q, s1 = w1.astype(jnp.bfloat16), jnp.ones((1, H1), jnp.float32)
        w4q, s4 = w4p.astype(jnp.bfloat16), jnp.ones((1, D_OUT), jnp.float32)
    return (
        w1q, s1,
        b1,                                                          # (1, H1)   f32
        _pad_to(w2, (H1, H2P)).astype(jnp.bfloat16),                 # (H1, 128)
        _pad_to(b2, (1, H2P)),                                       # (1, 128)  f32
        _pad_to(w3, (H2P, H3P)).astype(jnp.bfloat16),                # (128, 128)
        _pad_to(b3, (1, H3P)),                                       # (1, 128)  f32
        w4q, s4,
        b4,                                                          # (1, D_OUT) f32
    )


def modu_network_forward(H, padded_params):
    B = H.shape[0]
    x = H.reshape(B, -1)                                  # nn.Flatten() (NCHW row-major)
    Bp = ((B + 15) // 16) * 16                            # fill bf16 sublanes / MXU rows
    xp = jnp.pad(x, ((0, Bp - B), (0, 0))).astype(jnp.bfloat16)
    out = mlp_pallas(xp, padded_params)[:B]               # Pallas hot path (4x matmul+GELU)
    mtx_mod1 = out.reshape(B, 2, N, N)
    mtx_mod1_c = (mtx_mod1[:, 0, :, :] + 1j * mtx_mod1[:, 1, :, :]).astype(jnp.complex64)
    # TODO(synk): complex Householder QR has no clean Pallas TPU equivalent; plain JAX.
    q, _ = jnp.linalg.qr(mtx_mod1_c)                      # reduced QR, like torch default
    return jnp.stack([jnp.real(q), jnp.imag(q)], axis=1).astype(jnp.float32)


def init_params(key):
    # Deterministic init mimicking torch.nn.Linear default (uniform +-1/sqrt(fan_in)),
    # at the logical (unpadded) sizes of the module.
    dims = [(D_IN, H1), (H1, H2), (H2, H3), (H3, D_OUT)]
    params = []
    for fi, fo in dims:
        key, kw, kb = jax.random.split(key, 3)
        bound = float(1.0 / (fi ** 0.5))
        w = jax.random.uniform(kw, (fi, fo), jnp.float32, -bound, bound)
        b = jax.random.uniform(kb, (1, fo), jnp.float32, -bound, bound)
        params += [w, b]
    return tuple(params)


if __name__ == "__main__":
    key = jax.random.PRNGKey(0)
    kp, kh = jax.random.split(key)
    params = init_params(kp)
    padded_params = prepare_params(params, mode=_weight_mode())

    B = 2
    H = jax.random.normal(kh, (B, 2, M, N), dtype=jnp.float32)

    # Params passed as explicit jit args (not closure constants) so that at
    # production sizes they stay runtime buffers and can be donated/aliased.
    fwd = jax.jit(modu_network_forward)
    out = fwd(H, padded_params)
    jax.block_until_ready(out)

    assert out.shape == (B, 2, N, N), out.shape
    assert out.dtype == jnp.float32
    # sanity: columns of Q should be orthonormal -> Q^H Q ~ I
    qc = out[:, 0] + 1j * out[:, 1]
    gram = jnp.einsum("bij,bik->bjk", jnp.conj(qc), qc)
    err = float(jnp.max(jnp.abs(gram - jnp.eye(N, dtype=gram.dtype))))
    assert err < 1e-3, err

    print("KERNEL_OK")
</pallas_src>

<mosaic_0001>
module attributes {stable_mosaic.version = 11 : i64} {
  func.func @mlp_kernel(%arg0: memref<16x384xbf16, #tpu.memory_space<vmem>>, %arg1: memref<384x128xbf16, #tpu.memory_space<vmem>>, %arg2: memref<1x128xf32, #tpu.memory_space<vmem>>, %arg3: memref<1x128xf32, #tpu.memory_space<vmem>>, %arg4: memref<128x128xbf16, #tpu.memory_space<vmem>>, %arg5: memref<1x128xf32, #tpu.memory_space<vmem>>, %arg6: memref<128x128xbf16, #tpu.memory_space<vmem>>, %arg7: memref<1x128xf32, #tpu.memory_space<vmem>>, %arg8: memref<128x512xbf16, #tpu.memory_space<vmem>>, %arg9: memref<1x512xf32, #tpu.memory_space<vmem>>, %arg10: memref<1x512xf32, #tpu.memory_space<vmem>>, %arg11: memref<16x512xf32, #tpu.memory_space<vmem>>) attributes {dimension_semantics = [], scalar_prefetch = 0 : i64, scratch_operands = 0 : i64, tpu.core_type = #tpu.core_type<tc>} {
    %c0 = arith.constant 0 : index
    %c0_0 = arith.constant 0 : index
    %0 = vector.load %arg0[%c0, %c0_0] : memref<16x384xbf16, #tpu.memory_space<vmem>>, vector<16x384xbf16>
    %c0_1 = arith.constant 0 : index
    %c0_2 = arith.constant 0 : index
    %1 = vector.load %arg1[%c0_1, %c0_2] : memref<384x128xbf16, #tpu.memory_space<vmem>>, vector<384x128xbf16>
    %cst = arith.constant dense<0.000000e+00> : vector<16x128xf32>
    %2 = tpu.matmul %0, %1, %cst {dimension_numbers = #tpu.dot_dimension_numbers<[1], [0], [0], [1], [0, 0, 1, 1], [], []>} : vector<16x384xbf16>, vector<384x128xbf16>, vector<16x128xf32> -> vector<16x128xf32>
    %c0_3 = arith.constant 0 : index
    %c0_4 = arith.constant 0 : index
    %3 = vector.load %arg2[%c0_3, %c0_4] : memref<1x128xf32, #tpu.memory_space<vmem>>, vector<1x128xf32>
    %4 = vector.broadcast %3 : vector<1x128xf32> to vector<16x128xf32>
    %5 = arith.mulf %2, %4 : vector<16x128xf32>
    %c0_5 = arith.constant 0 : index
    %c0_6 = arith.constant 0 : index
    %6 = vector.load %arg3[%c0_5, %c0_6] : memref<1x128xf32, #tpu.memory_space<vmem>>, vector<1x128xf32>
    %7 = vector.broadcast %6 : vector<1x128xf32> to vector<16x128xf32>
    %8 = arith.addf %5, %7 : vector<16x128xf32>
    %cst_7 = arith.constant 5.000000e-01 : f32
    %9 = vector.broadcast %cst_7 : f32 to vector<16x128xf32>
    %10 = arith.mulf %9, %8 : vector<16x128xf32>
    %cst_8 = arith.constant 0.707106769 : f32
    %11 = vector.broadcast %cst_8 : f32 to vector<16x128xf32>
    %12 = arith.mulf %8, %11 : vector<16x128xf32>
    %13 = math.erf %12 : vector<16x128xf32>
    %cst_9 = arith.constant 1.000000e+00 : f32
    %14 = vector.broadcast %cst_9 : f32 to vector<16x128xf32>
    %15 = arith.addf %14, %13 : vector<16x128xf32>
    %16 = arith.mulf %10, %15 : vector<16x128xf32>
    %17 = arith.truncf %16 : vector<16x128xf32> to vector<16x128xbf16>
    %c0_10 = arith.constant 0 : index
    %c0_11 = arith.constant 0 : index
    %18 = vector.load %arg4[%c0_10, %c0_11] : memref<128x128xbf16, #tpu.memory_space<vmem>>, vector<128x128xbf16>
    %cst_12 = arith.constant dense<0.000000e+00> : vector<16x128xf32>
    %19 = tpu.matmul %17, %18, %cst_12 {dimension_numbers = #tpu.dot_dimension_numbers<[1], [0], [0], [1], [0, 0, 1, 1], [], []>} : vector<16x128xbf16>, vector<128x128xbf16>, vector<16x128xf32> -> vector<16x128xf32>
    %c0_13 = arith.constant 0 : index
    %c0_14 = arith.constant 0 : index
    %20 = vector.load %arg5[%c0_13, %c0_14] : memref<1x128xf32, #tpu.memory_space<vmem>>, vector<1x128xf32>
    %21 = vector.broadcast %20 : vector<1x128xf32> to vector<16x128xf32>
    %22 = arith.addf %19, %21 : vector<16x128xf32>
    %cst_15 = arith.constant 5.000000e-01 : f32
    %23 = vector.broadcast %cst_15 : f32 to vector<16x128xf32>
    %24 = arith.mulf %23, %22 : vector<16x128xf32>
    %cst_16 = arith.constant 0.707106769 : f32
    %25 = vector.broadcast %cst_16 : f32 to vector<16x128xf32>
    %26 = arith.mulf %22, %25 : vector<16x128xf32>
    %27 = math.erf %26 : vector<16x128xf32>
    %cst_17 = arith.constant 1.000000e+00 : f32
    %28 = vector.broadcast %cst_17 : f32 to vector<16x128xf32>
    %29 = arith.addf %28, %27 : vector<16x128xf32>
    %30 = arith.mulf %24, %29 : vector<16x128xf32>
    %31 = arith.truncf %30 : vector<16x128xf32> to vector<16x128xbf16>
    %c0_18 = arith.constant 0 : index
    %c0_19 = arith.constant 0 : index
    %32 = vector.load %arg6[%c0_18, %c0_19] : memref<128x128xbf16, #tpu.memory_space<vmem>>, vector<128x128xbf16>
    %cst_20 = arith.constant dense<0.000000e+00> : vector<16x128xf32>
    %33 = tpu.matmul %31, %32, %cst_20 {dimension_numbers = #tpu.dot_dimension_numbers<[1], [0], [0], [1], [0, 0, 1, 1], [], []>} : vector<16x128xbf16>, vector<128x128xbf16>, vector<16x128xf32> -> vector<16x128xf32>
    %c0_21 = arith.constant 0 : index
    %c0_22 = arith.constant 0 : index
    %34 = vector.load %arg7[%c0_21, %c0_22] : memref<1x128xf32, #tpu.memory_space<vmem>>, vector<1x128xf32>
    %35 = vector.broadcast %34 : vector<1x128xf32> to vector<16x128xf32>
    %36 = arith.addf %33, %35 : vector<16x128xf32>
    %cst_23 = arith.constant 5.000000e-01 : f32
    %37 = vector.broadcast %cst_23 : f32 to vector<16x128xf32>
    %38 = arith.mulf %37, %36 : vector<16x128xf32>
    %cst_24 = arith.constant 0.707106769 : f32
    %39 = vector.broadcast %cst_24 : f32 to vector<16x128xf32>
    %40 = arith.mulf %36, %39 : vector<16x128xf32>
    %41 = math.erf %40 : vector<16x128xf32>
    %cst_25 = arith.constant 1.000000e+00 : f32
    %42 = vector.broadcast %cst_25 : f32 to vector<16x128xf32>
    %43 = arith.addf %42, %41 : vector<16x128xf32>
    %44 = arith.mulf %38, %43 : vector<16x128xf32>
    %45 = arith.truncf %44 : vector<16x128xf32> to vector<16x128xbf16>
    %c0_26 = arith.constant 0 : index
    %c0_27 = arith.constant 0 : index
    %46 = vector.load %arg8[%c0_26, %c0_27] : memref<128x512xbf16, #tpu.memory_space<vmem>>, vector<128x512xbf16>
    %cst_28 = arith.constant dense<0.000000e+00> : vector<16x512xf32>
    %47 = tpu.matmul %45, %46, %cst_28 {dimension_numbers = #tpu.dot_dimension_numbers<[1], [0], [0], [1], [0, 0, 1, 1], [], []>} : vector<16x128xbf16>, vector<128x512xbf16>, vector<16x512xf32> -> vector<16x512xf32>
    %c0_29 = arith.constant 0 : index
    %c0_30 = arith.constant 0 : index
    %48 = vector.load %arg9[%c0_29, %c0_30] : memref<1x512xf32, #tpu.memory_space<vmem>>, vector<1x512xf32>
    %49 = vector.broadcast %48 : vector<1x512xf32> to vector<16x512xf32>
    %50 = arith.mulf %47, %49 : vector<16x512xf32>
    %c0_31 = arith.constant 0 : index
    %c0_32 = arith.constant 0 : index
    %51 = vector.load %arg10[%c0_31, %c0_32] : memref<1x512xf32, #tpu.memory_space<vmem>>, vector<1x512xf32>
    %52 = vector.broadcast %51 : vector<1x512xf32> to vector<16x512xf32>
    %53 = arith.addf %50, %52 : vector<16x512xf32>
    %c0_33 = arith.constant 0 : index
    %c0_34 = arith.constant 0 : index
    %54 = vector.load %arg11[%c0_33, %c0_34] : memref<16x512xf32, #tpu.memory_space<vmem>>, vector<16x512xf32>
    tpu.vector_store %arg11[%c0_33, %c0_34], %53 {strides = array<i32>} : memref<16x512xf32, #tpu.memory_space<vmem>>, vector<16x512xf32>,
    return
  }
}

</mosaic_0001>

<bundles_post_ra>
// kernel: custom-call.6
= control target key start
LH: loop header
LB: loop body
LE: loop exit
PB: predicated region body
PF: predicated region fallthrough
CT: control target
= control target key end

     0   :  { %s1295_s18 = smov 0   ;;  %s1297_s19 = smov 0   ;;  %s1628_s0 = inlined_call_operand.vmem [shape: f32[2,16,16], index: 0, kind: input, shape index: {}]   ;;  %s1629_s1 = inlined_call_operand.vmem [shape: f32[2,16,16], index: 1, kind: input, shape index: {}]   ;;  %s1630_s2 = inlined_call_operand.vmem [shape: f32[2,16,16], index: 2, kind: output, shape index: {0}]   ;;  %s1631_s3 = inlined_call_operand.vmem [shape: f32[2,16,16], index: 3, kind: output, shape index: {1}]   ;;  %s1632_s4 = inlined_call_operand.vmem [shape: f32[2,16], index: 4, kind: output, shape index: {2}]   ;;  %s1633_s5 = inlined_call_operand.vmem [shape: f32[2,16], index: 5, kind: output, shape index: {3}]  }
   0x1   :  { %s1299_s20 = smov 0   ;;  %s1301_s21 = smov 0  }
   0x2   :  { %s1303_s22 = smov 0  }
   0x3 LB: > { %s31_s23 = sadd.s32 1, %s1252_s21  ;;  %s1093_s24 = sadd.s32 4294967295, %s1256_s22   ;;  %s1256_s22 = sphi %s1303_s22, %s12_s22   ;;  %s1252_s21 = sphi %s1301_s21, %s1646_s21   ;;  %s1248_s20 = sphi %s1299_s20, %s1645_s20   ;;  %s1244_s19 = sphi %s1297_s19, %s1644_s19   ;;  %s1240_s18 = sphi %s1295_s18, %s1643_s18  }
   0x4   : > { %p33_p0 = scmp.ge.s32.totalorder %s31_s23, 2  ;;  %s36_s25 = ssub.s32 0, %s1252_s21 }
   0x5   : > { %s1095_s26 = smin.u32 %s1252_s21, %s36_s25  ;;  %p60_p1 = scmp.ne.s32.totalorder %s1244_s19, %s1240_s18 }
   0x6   : > { %s1648_s23 = smov (%p33_p0, %s31_s23), 0  ;;  %s38_s27 = sshrl.u32 %s1095_s26, 3 }
   0x7   : > { %s42_s28 = ssub.s32 0, %s1648_s23  ;;  %p61_p2 = scmp.eq.s32.totalorder %s1093_s24, 1 }
   0x8   : > { %s1096_s29 = smin.u32 %s42_s28, %s1648_s23  ;;  %s50_s8 = sadd.s32 1, %s1244_s19 }
   0x9   : > { %s44_s30 = sshrl.u32 %s1096_s29, 3  ;;  %p1332_p3 = por %p61_p2, %p60_p1 }
   0xa   : > { %s47_s7 = ssub.s32 %s38_s27, %s44_s30  ;;  %p1100_p5 = scmp.ge.s32.totalorder %s1256_s22, 2 }
   0xb   : > { %p48_p4 = scmp.eq.s32.totalorder %s47_s7, 0  ;;  %s123_s10 = sand.u32 (!%p1100_p5), 1, %s1256_s22  }
   0xc   : > { %121 = sbr.rel (%p1100_p5) target bundleno = 20 (0x14), region = 16  ;;  %s1147_s11 = sshll.u32 (!%p1100_p5), %s1252_s21, 4 }
   0xd   : > { %s1338_s9 = scalar_select %p48_p4, %s1244_s19, %s50_s8  }
   0xe   : > { %s1101_s12 = sshll.u32 (!%p1100_p5), %s123_s10, 4  ;;  %s131_s15 = scalar_lea.vmem (!%p1100_p5), %s1628_s0, %s1147_s11 }
   0xf   : > { %s125_s16 = scalar_lea.vmem (!%p1100_p5), [#allocation0], %s1101_s12  ;;  %s178_s26 = scalar_lea.vmem (!%p1100_p5), %s1629_s1, %s1147_s11 }
  0x10   : > { %s172_s27 = scalar_lea.vmem (!%p1100_p5), [#allocation1], %s1101_s12 }
  0x11   : > { %v162_v0 = vld [vmem:[%s131_s15] sm:$0xff]  ;;  %v164_v1 = vld [vmem:[%s131_s15 + $0x8] sm:$0xff] }
  0x12   : > { %163 = vst [vmem:[%s125_s16] sm:$0xff] %v162_v0  ;;  %165 = vst [vmem:[%s125_s16 + $0x8] sm:$0xff] %v164_v1  ;;  %v209_v2 = vld [vmem:[%s178_s26] sm:$0xff]  ;;  %v211_v3 = vld [vmem:[%s178_s26 + $0x8] sm:$0xff] }
  0x13   : > { %210 = vst [vmem:[%s172_s27] sm:$0xff] %v209_v2  ;;  %212 = vst [vmem:[%s172_s27 + $0x8] sm:$0xff] %v211_v3 }
  0x14 PF: > { %p1107_p6 = scmp.ge.s32.totalorder %s1256_s22, 1  ;;  %p217_p7 = scmp.lt.s32.totalorder %s1256_s22, 3 }
  0x16   : > { %p218_p8 = pnand %p1107_p6, %p217_p7 }
  0x18   : > { %221 = sbr.rel (%p218_p8) target bundleno = 397 (0x18d), region = 88 }
  0x1d   : > { %s224_s28 = sand.u32 1, %s1093_s24   ;;  %s250_s29 = sand.u32 1, %s1240_s18   ;;  %v1262_v8 = vmov 0.0  }
  0x1e   : > { %s1108_s30 = sshll.u32 %s224_s28, 4  ;;  %s1354_s7 = sshll.u32 %s250_s29, 1 }
  0x1f   : > { %s226_s8 = scalar_lea.vmem [#allocation0], %s1108_s30  ;;  %s230_s10 = scalar_lea.vmem [#allocation1], %s1108_s30 }
  0x20   : > { %v278_v4 = vld [vmem:[%s226_s8] sm:$0xff]  ;;  %v1114_v5 = vld [vmem:[%s226_s8 + $0x8] sm:$0xff]  ;;  %s1356_s11 = scalar_lea.vmem [#allocation2], %s1108_s30  ;;  %s1360_s12 = scalar_lea.vmem [#allocation3], %s1108_s30 }
  0x21   : > { %v284_v6 = vld [vmem:[%s230_s10] sm:$0xff]  ;;  %279 = vst [vmem:[%s1356_s11] sm:$0xff] %v278_v4  ;;  %1115 = vst [vmem:[%s1356_s11 + $0x8] sm:$0xff] %v1114_v5  ;;  %v1116_v7 = vld [vmem:[%s230_s10 + $0x8] sm:$0xff]  ;;  %s275_s18 = sand.u32 7, %s1248_s20   ;;  %s252_s14 = scalar_lea.vmem [#allocation5], %s1354_s7 }
  0x22   : > { %285 = vst [vmem:[%s1360_s12] sm:$0xff] %v284_v6  ;;  %1117 = vst [vmem:[%s1360_s12 + $0x8] sm:$0xff] %v1116_v7  ;;  %s1365_s24 = scalar_lea.vmem [#allocation4], %s275_s18  ;;  %s1368_s13 = scalar_lea.vmem [#allocation6], %s275_s18 }
  0x23   : > { %290 = vst [vmem:[%s1365_s24] sm:$0x1] %v1262_v8  ;;  %291 = vst [vmem:[%s1368_s13] sm:$0x1] %v1262_v8  ;;  %s258_s15 = scalar_lea.vmem [#allocation7], %s1354_s7  ;;  %s1373_s16 = smov 0  }
  0x24 LB: >> { %v300_v9 = vlaneseq  ;;  %v1384_v13 = vstv %s1260_s16  ;;  %s359_s17 = scalar_lea.vmem %s1356_s11, %s1260_s16 [#allocation2]  ;;  %s360_s25 = scalar_lea.vmem %s1360_s12, %s1260_s16 [#allocation3]  ;;  %s1260_s16 = sphi %s1373_s16, %s297_s16  }
  0x25   : >> { %s540_s26 = scalar_lea.vmem [#allocation9], %s1260_s16  ;;  %s539_s27 = scalar_lea.vmem [#allocation8], %s1260_s16 }
  0x26   : >> { %v1381_v12 = vshrl.u32 %v300_v9, 7  ;;  %s1524_s28 = smov [#allocation8]  ;;  %s1526_s29 = smov [#allocation9] }
  0x28   : >> { %v298_v10 = vld [vmem:[%s1356_s11] sm:$0xff]  ;;  %vm304_vm0 = vcmp.gt.s32.totalorder %v1381_v12, %v1384_v13  ;;  %v1118_v14 = vld [vmem:[%s1356_s11 + $0x8] sm:$0xff]  ;;  %v323_v16 = vadd.s32 8, %v1381_v12  ;;  %v408_v12 = vmov %v1381_v12  ;;  %s404_s11 = smov %s1356_s11 }
  0x29   : >> { %v299_v11 = vld [vmem:[%s1360_s12] sm:$0xff]  ;;  %v1119_v15 = vld [vmem:[%s1360_s12 + $0x8] sm:$0xff]  ;;  %v305_v17 = vsel %vm304_vm0, %v298_v10, 0.0  ;;  %v475_v10 = vadd.s32 8, %v408_v12  ;;  %s405_s12 = smov %s1360_s12  ;;  %vm413_vm13 = vcmp.gt.s32.totalorder %v408_v12, %v1384_v13  ;;  %v569_v12 = vmov %v1381_v12 }
  0x2a   : >> { %v306_v18 = vsel %vm304_vm0, %v299_v11, 0.0  ;;  %v310_v20 = vmul.f32 %v305_v17, %v305_v17  ;;  %vm325_vm1 = vcmp.gt.s32.totalorder %v323_v16, %v1384_v13  ;;  %v1396_v36 = vld [vmem:[%s359_s17] ss:$0 sm:$0xff] }
  0x2b   : >> { %v307_v19 = vxor.u32 2147483648, %v306_v18  ;;  %v328_v21 = vsel %vm325_vm1, %v1118_v14, 0.0  ;;  %v329_v22 = vsel %vm325_vm1, %v1119_v15, 0.0  ;;  %v1398_v37 = vld [vmem:[%s360_s25] ss:$0 sm:$0xff]  ;;  %vm389_vm8 = vcmp.lt.f32.partialorder %v1396_v36, 0.0 }
  0x2c   : >> { %v330_v24 = vxor.u32 2147483648, %v329_v22  ;;  %v333_v25 = vmul.f32 %v328_v21, %v328_v21  ;;  %v363_v38 = vand.u32 2147483647, %v1396_v36  ;;  %v364_v39 = vand.u32 2147483647, %v1398_v37  ;;  %v409_v17 = vld [vmem:[%s404_s11] sm:$0xff] }
  0x2d   : >> { %v311_v23 = vmul.f32 %v307_v19, %v306_v18  ;;  %vm398_vm7 = vcmp.eq.f32.partialorder %v1398_v37, 0.0  ;;  %vm477_vm11 = vcmp.gt.s32.totalorder %v475_v10, %v1384_v13  ;;  %vm478_vm12 = vcmp.lt.s32.totalorder %v475_v10, 16  ;;  %v410_v18 = vld [vmem:[%s405_s12] sm:$0xff]  ;;  %v1121_v21 = vld [vmem:[%s404_s11 + $0x8] sm:$0xff]  ;;  %s1515_s11 = smov %s1356_s11 }
  0x2e   : >> { %v334_v27 = vmul.f32 %v330_v24, %v329_v22  ;;  %v365_v44 = vmax.f32 %v363_v38, %v364_v39  ;;  %v1122_v22 = vld [vmem:[%s405_s12 + $0x8] sm:$0xff]  ;;  %vm479_vm14 = vmand %vm477_vm11, %vm478_vm12  ;;  %v415_v24 = vsel %vm413_vm13, %v410_v18, 0.0  ;;  %s1518_s12 = smov %s1360_s12 }
  0x2f   : >> { %v312_v26 = vsub.f32 %v310_v20, %v311_v23  ;;  %v414_v23 = vsel %vm413_vm13, %v409_v17, 0.0  ;;  %vm452_vm15 = vcmp.eq.f32.partialorder %v415_v24, 0.0 }
  0x30   : >> { %v335_v28 = vsub.f32 %v333_v25, %v334_v27  ;;  %v481_v27 = vsel %vm479_vm14, %v1122_v22, 0.0  ;;  %vm450_vm0 = vcmp.eq.f32.partialorder %v414_v23, 0.0 }
  0x31   : >> { %vm518_vm1 = vcmp.eq.f32.partialorder %v481_v27, 0.0 }
  0x32   : >> { %v340_v29 = vadd.f32 %v335_v28, %v312_v26  ;;  %v480_v26 = vsel %vm479_vm14, %v1121_v21, 0.0 }
  0x34   : >> { %v341_v30 = vrot.slane %v340_v29, 4 }
  0x36   : >> { %v342_v31 = vadd.f32 %v341_v30, %v340_v29 }
  0x38   : >> { %v343_v32 = vrot.slane %v342_v31, 2 }
  0x3a   : >> { %v344_v33 = vadd.f32 %v343_v32, %v342_v31  ;;  %v448_v32 = vand.u32 2147483648, %v415_v24 }
  0x3c   : >> { %v345_v34 = vrot.slane %v344_v33, 1 }
  0x3e   : >> { %v346_v35 = vadd.f32 %v345_v34, %v344_v33  ;;  %v446_v33 = vand.u32 2147483648, %v414_v23  ;;  %v514_v34 = vand.u32 2147483648, %v481_v27 }
  0x40   : >> { %1202 = vrsqrt.f32 %v346_v35  ;;  %vm349_vm2 = vcmp.eq.f32.partialorder %v346_v35, inf  ;;  %v352_v41 = vand.u32 2147483648, %v346_v35  ;;  %vm351_vm3 = vcmp.eq.f32.partialorder %v346_v35, 0.0 }
  0x41   : >> { %vm1408_vm9 = vmand %vm351_vm3, %vm398_vm7 }
  0x4d   : >> { %v1203_v40 = vpop.eup %1202 }
  0x4e   : >> { %v348_v42 = vmul.f32 %v1203_v40, %v346_v35 }
  0x50   : >> { %v350_v43 = vsel %vm349_vm2, %v346_v35, %v348_v42  ;;  %v512_v35 = vand.u32 2147483648, %v480_v26 }
  0x51   : >> { %v353_v45 = vsel %vm351_vm3, %v352_v41, %v350_v43  ;;  %vm516_vm3 = vcmp.eq.f32.partialorder %v480_v26, 0.0 }
  0x52   : >> { %v366_v46 = vand.u32 2147483647, %v353_v45 }
  0x54   : >> { %v367_v47 = vmax.f32 %v365_v44, %v366_v46 }
  0x56   : >> { %1204 = vrcp.f32 %v367_v47  ;;  %vm379_vm6 = vcmp.eq.f32.partialorder %v367_v47, 0.0 }
  0x63   : >> { %v1205_v48 = vpop.eup %1204 }
  0x64   : >> { %v369_v49 = vmul.f32 %v1205_v48, %v363_v38  ;;  %v372_v50 = vmul.f32 %v1205_v48, %v364_v39  ;;  %v376_v51 = vmul.f32 %v1205_v48, %v366_v46  ;;  %v449_v46 = vor.u32 inf, %v448_v32 }
  0x65   : >> { %v447_v48 = vor.u32 inf, %v446_v33 }
  0x66   : >> { %v370_v52 = vmul.f32 %v369_v49, %v369_v49  ;;  %v373_v53 = vmul.f32 %v372_v50, %v372_v50  ;;  %v377_v54 = vmul.f32 %v376_v51, %v376_v51  ;;  %v515_v49 = vor.u32 inf, %v514_v34 }
  0x67   : >> { %v513_v50 = vor.u32 inf, %v512_v35  ;;  %v395_v51 = vxor.u32 2147483648, %v1398_v37 }
  0x68   : >> { %v374_v55 = vadd.f32 %v373_v53, %v370_v52 }
  0x6a   : >> { %v378_v56 = vadd.f32 %v377_v54, %v374_v55 }
  0x6c   : >> { %1206 = vrsqrt.f32 %v378_v56  ;;  %vm382_vm4 = vcmp.eq.f32.partialorder %v378_v56, inf  ;;  %v385_v58 = vand.u32 2147483648, %v378_v56  ;;  %vm384_vm5 = vcmp.eq.f32.partialorder %v378_v56, 0.0 }
  0x79   : >> { %v1207_v57 = vpop.eup %1206 }
  0x7a   : >> { %v381_v59 = vmul.f32 %v1207_v57, %v378_v56 }
  0x7c   : >> { %v383_v60 = vsel %vm382_vm4, %v378_v56, %v381_v59  ;;  %v451_v59 = vsel %vm450_vm0, nan, %v447_v48  ;;  %v1126_v48 = vld [vmem:[%s1518_s12 + $0x8] sm:$0xff] }
  0x7d   : >> { %v386_v61 = vsel %vm384_vm5, %v385_v58, %v383_v60  ;;  %v519_v60 = vsel %vm518_vm1, nan, %v515_v49 }
  0x7e   : >> { %v387_v62 = vmul.f32 %v386_v61, %v367_v47  ;;  %v1450_v47 = vand.u32 127, %v300_v9  ;;  %v517_v61 = vsel %vm516_vm3, nan, %v513_v50 }
  0x80   : >> { %v388_v63 = vsel %vm379_vm6, 0.0, %v387_v62  ;;  %vm1474_vm5 = vcmp.eq.s32.totalorder %v1450_v47, %v1384_v13 }
  0x81   : >> { %v390_v0 = vxor.u32 2147483648, %v388_v63 }
  0x83   : >> { %v1412_v2 = vsel %vm389_vm8, %v388_v63, %v390_v0 }
  0x84   : >> { %v1418_v3 = vsel %vm1408_vm9, %v1396_v36, %v1412_v2  ;;  %v392_v52 = vsub.f32 %v1412_v2, %v1396_v36 }
  0x85   : >> { %v1422_v4 = vsub.f32 %v1396_v36, %v1418_v3  ;;  %v453_v36 = vsel %vm452_vm15, nan, %v449_v46 }
  0x87   : >> { %v418_v5 = vand.u32 2147483647, %v1422_v4  ;;  %vm443_vm2 = vcmp.eq.f32.partialorder %v1422_v4, 0.0 }
  0x88   : >> { %vm1466_vm4 = vmand %vm443_vm2, %vm398_vm7 }
  0x89   : >> { %vm1425_vm10 = vcmp.lt.f32.partialorder %v418_v5, %v364_v39 }
  0x8a   : >> { %v422_v7 = vsel %vm1425_vm10, %v1398_v37, %v1422_v4  ;;  %v421_v8 = vsel %vm1425_vm10, %v1422_v4, %v1398_v37 }
  0x8b   : >> { %1208 = vrcp.f32 %v422_v7 }
  0x8c   : >> { %1210 = vrcp.f32 %v1412_v2 }
  0x98   : >> { %v1209_v11 = vpop.eup %1208 }
  0x99   : >> { %v424_v14 = vmul.f32 %v1209_v11, %v421_v8  ;;  %v1211_v56 = vpop.eup %1210 }
  0x9a   : >> { %v394_v5 = vmul.f32 %v1211_v56, %v392_v52 }
  0x9b   : >> { %v425_v15 = vmul.f32 %v424_v14, %v1422_v4  ;;  %v427_v16 = vmul.f32 %v424_v14, %v1398_v37  ;;  %v429_v28 = vmul.f32 %v424_v14, %v414_v23  ;;  %v431_v29 = vmul.f32 %v424_v14, %v415_v24 }
  0x9c   : >> { %v495_v30 = vmul.f32 %v480_v26, %v424_v14  ;;  %v497_v31 = vmul.f32 %v481_v27, %v424_v14  ;;  %v401_v22 = vsel %vm1408_vm9, 0.0, %v394_v5 }
  0x9d   : >> { %v426_v19 = vadd.f32 %v425_v15, %v1398_v37  ;;  %v428_v20 = vadd.f32 %v427_v16, %v1422_v4  ;;  %v438_v38 = vsub.f32 %v431_v29, %v414_v23  ;;  %v440_v39 = vsub.f32 %v415_v24, %v429_v28 }
  0x9e   : >> { %v430_v40 = vadd.f32 %v429_v28, %v415_v24  ;;  %v432_v41 = vadd.f32 %v431_v29, %v414_v23  ;;  %v504_v42 = vsub.f32 %v497_v31, %v480_v26  ;;  %v506_v43 = vsub.f32 %v481_v27, %v495_v30 }
  0x9f   : >> { %v434_v25 = vsel %vm1425_vm10, %v426_v19, %v428_v20  ;;  %v496_v44 = vadd.f32 %v495_v30, %v481_v27  ;;  %v498_v45 = vadd.f32 %v497_v31, %v480_v26  ;;  %v441_v53 = vsel %vm1425_vm10, %v438_v38, %v440_v39  ;;  %v558_v30 = vld [vmem:[%s1368_s13] ss:$0 sm:$0xff] }
  0xa0   : >> { %1212 = vrcp.f32 %v434_v25  ;;  %v433_v9 = vsel %vm1425_vm10, %v430_v40, %v432_v41  ;;  %v507_v54 = vsel %vm1425_vm10, %v504_v42, %v506_v43  ;;  %v397_v37 = vmul.f32 %v1211_v56, %v395_v51  ;;  %v557_v31 = vld [vmem:[%s1365_s24] ss:$0 sm:$0xff]  ;;  %v1125_v42 = vld [vmem:[%s1515_s11 + $0x8] sm:$0xff] }
  0xa1   : >> { %v499_v55 = vsel %vm1425_vm10, %v496_v44, %v498_v45  ;;  %v547_v24 = vsel %vm1474_vm5, %v401_v22, 0.0  ;;  %v1263_v28 = vmov 0.0   ;;  %v1264_v29 = vmov 1.0   ;;  %v573_v38 = vld [vmem:[%s1515_s11] sm:$0xff]  ;;  %s1543_s11 = smov %s1515_s11 }
  0xa2   : >> { %v402_v21 = vsel %vm1408_vm9, 0.0, %v397_v37  ;;  %v574_v39 = vld [vmem:[%s1518_s12] sm:$0xff]  ;;  %v585_v44 = vadd.s32 8, %v569_v12  ;;  %v627_v12 = vmov %v1381_v12  ;;  %s1546_s12 = smov %s1518_s12  ;;  %s708_s30 = scalar_lea.vmem %s1543_s11, %s1260_s16 }
  0xa3   : >> { %v548_v23 = vsel %vm1474_vm5, %v402_v21, 0.0  ;;  %v671_v22 = vadd.s32 8, %v627_v12  ;;  %vm665_vm7 = vcmp.ge.s32.totalorder %v627_v12, %v1384_v13  ;;  %s709_s8 = scalar_lea.vmem %s1546_s12, %s1260_s16  ;;  %s297_s16 = sadd.s32 1, %s1260_s16  }
  0xa4   : >> { %vm604_vm6 = vcmp.lt.s32.totalorder %v585_v44, 16  ;;  %vm666_vm10 = vmand %vm1474_vm5, %vm665_vm7  ;;  %p294_p9 = scmp.ge.s32.totalorder %s297_s16, 16  }
  0xa5   : >> { %vm702_vm8 = vcmp.ge.s32.totalorder %v671_v22, %v1384_v13  ;;  %s1149_s10 = sshll.u32 (%p294_p9), %s1248_s20, 4 }
  0xa6   : >> { %vm703_vm11 = vmand %vm1474_vm5, %vm702_vm8  ;;  %s757_s16 = scalar_lea.vmem (%p294_p9), %s1630_s2, %s1149_s10  ;;  %s800_s25 = scalar_lea.vmem (%p294_p9), %s1631_s3, %s1149_s10 }
  0xad   : >> { %v1213_v57 = vpop.eup %1212 }
  0xae   : >> { %v442_v62 = vmul.f32 %v1213_v57, %v441_v53  ;;  %v436_v63 = vmul.f32 %v1213_v57, %v433_v9  ;;  %v508_v0 = vmul.f32 %v1213_v57, %v507_v54  ;;  %v502_v2 = vmul.f32 %v1213_v57, %v499_v55 }
  0xb0   : >> { %v455_v6 = vsel %vm1466_vm4, %v453_v36, %v442_v62  ;;  %v454_v7 = vsel %vm1466_vm4, %v451_v59, %v436_v63  ;;  %v521_v8 = vsel %vm1466_vm4, %v519_v60, %v508_v0  ;;  %v520_v10 = vsel %vm1466_vm4, %v517_v61, %v502_v2 }
  0xb1   : >> { %v458_v11 = vsel %vm1408_vm9, 0.0, %v455_v6  ;;  %v457_v14 = vsel %vm1408_vm9, 0.0, %v454_v7  ;;  %v524_v15 = vsel %vm1408_vm9, 0.0, %v521_v8  ;;  %v523_v16 = vsel %vm1408_vm9, 0.0, %v520_v10 }
  0xb2   : >> { %v464_v17 = vsel %vm1474_vm5, %v458_v11, 0.0  ;;  %v463_v18 = vsel %vm1474_vm5, %v457_v14, 0.0  ;;  %v530_v19 = vsel %vm1474_vm5, %v524_v15, 0.0  ;;  %v529_v20 = vsel %vm1474_vm5, %v523_v16, 0.0 }
  0xb3   : >> { %467 = vadd.xlane.f32.xlu0 %v464_v17  ;;  %465 = vadd.xlane.f32.xlu1 %v463_v18  ;;  %vm655_vm9 = vcmp.gt.s32.totalorder %v1450_v47, %v1384_v13 }
  0xb7   : >> { %533 = vadd.xlane.f32.xlu0 %v530_v19  ;;  %531 = vadd.xlane.f32.xlu1 %v529_v20 }
  0xbb   : >> { %551 = vadd.xlane.f32.xlu0 %v548_v23  ;;  %549 = vadd.xlane.f32.xlu1 %v547_v24 }
 0x13c   : >> { %v468_v25 = vpop.xlane.xlu0 %467  ;;  %v466_v26 = vpop.xlane.xlu1 %465 }
 0x13d   : >> { %470 = vst [vmem:[#allocation9] sm:$0xff] %v468_v25  ;;  %469 = vst [vmem:[#allocation8] sm:$0xff] %v466_v26 }
 0x140   : >> { %v534_v1 = vpop.xlane.xlu0 %533  ;;  %v532_v27 = vpop.xlane.xlu1 %531 }
 0x141   : >> { %538 = vst [vmem:[#allocation9 + $0x8] sm:$0xff] %v534_v1  ;;  %537 = vst [vmem:[#allocation8 + $0x8] sm:$0xff] %v532_v27 }
 0x142   : >> { %542 = vst [vmem:[%s540_s26] sm:$0x1] %v1263_v28  ;;  %541 = vst [vmem:[%s539_s27] sm:$0x1] %v1264_v29 }
 0x144   : >> { %v552_v32 = vpop.xlane.xlu0 %551  ;;  %v550_v33 = vpop.xlane.xlu1 %549 }
 0x145   : >> { %v560_v34 = vsel %vm1474_vm5, %v552_v32, %v558_v30  ;;  %v559_v35 = vsel %vm1474_vm5, %v550_v33, %v557_v31  ;;  %v628_v15 = vxor.u32 2147483648, %v552_v32  ;;  %v652_v32 = vld [vmem:[%s1543_s11] sm:$0xff] }
 0x146   : >> { %562 = vst [vmem:[%s1368_s13] sm:$0x1] %v560_v34  ;;  %561 = vst [vmem:[%s1365_s24] sm:$0x1] %v559_v35 }
 0x149   : >> { %v571_v40 = vld [vmem:[%s1524_s28] sm:$0xff]  ;;  %v1123_v45 = vld [vmem:[%s1524_s28 + $0x8] sm:$0xff]  ;;  %s623_s28 = smov %s1524_s28 }
 0x14a   : >> { %v572_v41 = vld [vmem:[%s1526_s29] sm:$0xff]  ;;  %v1124_v46 = vld [vmem:[%s1526_s29 + $0x8] sm:$0xff]  ;;  %v578_v50 = vmul.f32 %v573_v38, %v571_v40  ;;  %v581_v52 = vmul.f32 %v574_v39, %v571_v40  ;;  %v597_v9 = vmul.f32 %v1125_v42, %v1123_v45  ;;  %v600_v55 = vmul.f32 %v1126_v48, %v1123_v45  ;;  %s624_s29 = smov %s1526_s29 }
 0x14b   : >> { %v575_v43 = vxor.u32 2147483648, %v572_v41  ;;  %v594_v49 = vxor.u32 2147483648, %v1124_v46  ;;  %v641_v25 = vld [vmem:[%s623_s28] sm:$0xff]  ;;  %v1127_v1 = vld [vmem:[%s623_s28 + $0x8] sm:$0xff] }
 0x14c   : >> { %v642_v26 = vld [vmem:[%s624_s29] sm:$0xff]  ;;  %v1128_v27 = vld [vmem:[%s624_s29 + $0x8] sm:$0xff] }
 0x14d   : >> { %v579_v51 = vmul.f32 %v575_v43, %v574_v39  ;;  %v582_v53 = vmul.f32 %v575_v43, %v573_v38  ;;  %v598_v54 = vmul.f32 %v1126_v48, %v594_v49  ;;  %v601_v56 = vmul.f32 %v1125_v42, %v594_v49  ;;  %v1129_v40 = vld [vmem:[%s1543_s11 + $0x8] sm:$0xff] }
 0x14e   : >> { %v1130_v41 = vld [vmem:[%s1546_s12 + $0x8] sm:$0xff] }
 0x14f   : >> { %v580_v57 = vsub.f32 %v578_v50, %v579_v51  ;;  %v583_v58 = vadd.f32 %v582_v53, %v581_v52  ;;  %v599_v36 = vsub.f32 %v597_v9, %v598_v54  ;;  %v602_v59 = vadd.f32 %v601_v56, %v600_v55 }
 0x151   : >> { %v605_v60 = vsel %vm604_vm6, %v599_v36, 0.0  ;;  %v606_v61 = vsel %vm604_vm6, %v602_v59, 0.0  ;;  %v724_v36 = vld [vmem:[#allocation4] sm:$0x3] (%p294_p9) }
 0x152   : >> { %v607_v62 = vadd.f32 %v605_v60, %v580_v57  ;;  %v608_v63 = vadd.f32 %v606_v61, %v583_v58  ;;  %727 = vst [vmem:[%s252_s14] sm:$0x3] (%p294_p9), %v724_v36 }
 0x154   : >> { %v609_v0 = vrot.slane %v607_v62, 4  ;;  %v615_v2 = vrot.slane %v608_v63, 4 }
 0x156   : >> { %v610_v37 = vadd.f32 %v609_v0, %v607_v62  ;;  %v616_v5 = vadd.f32 %v615_v2, %v608_v63 }
 0x158   : >> { %v611_v6 = vrot.slane %v610_v37, 2  ;;  %v617_v7 = vrot.slane %v616_v5, 2 }
 0x15a   : >> { %v612_v8 = vadd.f32 %v611_v6, %v610_v37  ;;  %v618_v10 = vadd.f32 %v617_v7, %v616_v5 }
 0x15c   : >> { %v613_v11 = vrot.slane %v612_v8, 1  ;;  %v619_v14 = vrot.slane %v618_v10, 1 }
 0x15e   : >> { %v614_v16 = vadd.f32 %v613_v11, %v612_v8  ;;  %v620_v17 = vadd.f32 %v619_v14, %v618_v10 }
 0x160   : >> { %v632_v18 = vmul.f32 %v628_v15, %v620_v17  ;;  %v634_v19 = vmul.f32 %v628_v15, %v614_v16  ;;  %v631_v20 = vmul.f32 %v614_v16, %v550_v33  ;;  %v635_v21 = vmul.f32 %v620_v17, %v550_v33  ;;  %v653_v33 = vld [vmem:[%s1546_s12] sm:$0xff] }
 0x162   : >> { %v633_v23 = vsub.f32 %v631_v20, %v632_v18  ;;  %v636_v24 = vadd.f32 %v635_v21, %v634_v19 }
 0x164   : >> { %v645_v28 = vmul.f32 %v641_v25, %v633_v23  ;;  %v646_v29 = vmul.f32 %v642_v26, %v636_v24  ;;  %v648_v30 = vmul.f32 %v641_v25, %v636_v24  ;;  %v649_v31 = vmul.f32 %v642_v26, %v633_v23 }
 0x165   : >> { %v680_v34 = vmul.f32 %v1127_v1, %v633_v23  ;;  %v681_v35 = vmul.f32 %v1128_v27, %v636_v24  ;;  %v683_v38 = vmul.f32 %v1127_v1, %v636_v24  ;;  %v684_v39 = vmul.f32 %v1128_v27, %v633_v23 }
 0x166   : >> { %v647_v42 = vsub.f32 %v645_v28, %v646_v29  ;;  %v650_v43 = vadd.f32 %v649_v31, %v648_v30 }
 0x167   : >> { %v682_v44 = vsub.f32 %v680_v34, %v681_v35  ;;  %v685_v45 = vadd.f32 %v684_v39, %v683_v38 }
 0x168   : >> { %v656_v46 = vsub.f32 %v652_v32, %v647_v42  ;;  %v657_v48 = vsub.f32 %v653_v33, %v650_v43 }
 0x169   : >> { %v693_v47 = vsub.f32 %v1129_v40, %v682_v44  ;;  %v694_v49 = vsub.f32 %v1130_v41, %v685_v45 }
 0x16a   : >> { %v658_v50 = vsel %vm655_vm9, %v656_v46, %v652_v32  ;;  %v659_v51 = vsel %vm655_vm9, %v657_v48, %v653_v33 }
 0x16b   : >> { %v667_v52 = vsel %vm666_vm10, %v641_v25, %v658_v50  ;;  %v668_v12 = vsel %vm666_vm10, %v642_v26, %v659_v51  ;;  %v695_v13 = vsel %vm655_vm9, %v693_v47, %v1129_v40  ;;  %v696_v53 = vsel %vm655_vm9, %v694_v49, %v1130_v41 }
 0x16c   : >> { %669 = vst [vmem:[%s1543_s11] sm:$0xff] %v667_v52  ;;  %670 = vst [vmem:[%s1546_s12] sm:$0xff] %v668_v12  ;;  %v704_v9 = vsel %vm703_vm11, %v1127_v1, %v695_v13  ;;  %v705_v54 = vsel %vm703_vm11, %v1128_v27, %v696_v53 }
 0x16d   : >> { %1131 = vst [vmem:[%s1543_s11 + $0x8] sm:$0xff] %v704_v9  ;;  %1132 = vst [vmem:[%s1546_s12 + $0x8] sm:$0xff] %v705_v54 }
 0x173   : > { %296 = sbr.rel (!%p294_p9) target bundleno = 36 (0x24), region = 327 }
 0x174   : >> { %v710_v55 = vld [vmem:[%s708_s30] ss:$0 sm:$0xff] }
 0x175   : >> { %v711_v56 = vld [vmem:[%s709_s8] ss:$0 sm:$0xff]  ;;  %v716_v57 = vsel %vm1474_vm5, %v1418_v3, %v710_v55  ;;  %v732_v3 = vld [vmem:[#allocation6] sm:$0x3] (%p294_p9) }
 0x176   : >> { %v717_v58 = vsel %vm1474_vm5, 0.0, %v711_v56  ;;  %718 = vst [vmem:[%s708_s30] sm:$0x1] %v716_v57  ;;  %735 = vst [vmem:[%s258_s15] sm:$0x3] (%p294_p9), %v732_v3 }
 0x177   : >> { %719 = vst [vmem:[%s709_s8] sm:$0x1] %v717_v58 }
 0x178   : > { %p841_p10 = scmp.lt.s32.totalorder (%p1332_p3), %s1248_s20, 0  ;;  %s842_s26 = ssub.s32 (%p1332_p3), 0, %s1248_s20  ;;  %v865_v62 = vld [vmem:[%s252_s14] sm:$0x3] (%p1332_p3) }
 0x17b   : > { %840 = sbr.rel (!%p1332_p3) target bundleno = 388 (0x184), region = 167 }
 0x17d   : > { %v788_v4 = vld [vmem:[%s1356_s11] sm:$0xff]  ;;  %v790_v59 = vld [vmem:[%s1356_s11 + $0x8] sm:$0xff]  ;;  %s1141_s11 = smin.u32 (%p1332_p3), %s1248_s20, %s842_s26 }
 0x17e   : > { %v831_v60 = vld [vmem:[%s1360_s12] sm:$0xff]  ;;  %v833_v61 = vld [vmem:[%s1360_s12 + $0x8] sm:$0xff]  ;;  %789 = vst [vmem:[%s757_s16] sm:$0xff] %v788_v4  ;;  %791 = vst [vmem:[%s757_s16 + $0x8] sm:$0xff] %v790_v59  ;;  %s844_s27 = sshrl.u32 (%p1332_p3), %s1141_s11, 3 }
 0x17f   : > { %832 = vst [vmem:[%s800_s25] sm:$0xff] %v831_v60  ;;  %834 = vst [vmem:[%s800_s25 + $0x8] sm:$0xff] %v833_v61  ;;  %s845_s28 = ssub.s32 (%p1332_p3), 0, %s844_s27 }
 0x180   : > { %s1650_s28 = smov (!%p841_p10, %s845_s28), %s844_s27 }
 0x181   : > { %s1142_s12 = sshll.u32 %s1650_s28, 1 }
 0x182   : > { %s848_s8 = scalar_lea.vmem %s1632_s4, %s1142_s12 }
 0x183   : > { %866 = vst [vmem:[%s848_s8] sm:$0x3] %v865_v62 }
 0x184 PF: > { %884 = sbr.rel (!%p1332_p3) target bundleno = 397 (0x18d), region = 201  ;;  %p885_p11 = scmp.lt.s32.totalorder (%p1332_p3), %s1248_s20, 0  ;;  %v909_v63 = vld [vmem:[%s258_s15] sm:$0x3] (%p1332_p3) }
 0x185   : > { %s886_s10 = ssub.s32 (%p1332_p3), 0, %s1248_s20 }
 0x186   : > { %s1143_s18 = smin.u32 (%p1332_p3), %s1248_s20, %s886_s10 }
 0x187   : > { %s888_s17 = sshrl.u32 (%p1332_p3), %s1143_s18, 3 }
 0x188   : > { %s889_s16 = ssub.s32 (%p1332_p3), 0, %s888_s17 }
 0x189   : > { %s1652_s16 = smov (!%p885_p11, %s889_s16), %s888_s17 }
 0x18a   : > { %s1144_s14 = sshll.u32 %s1652_s16, 1 }
 0x18b   : > { %s892_s25 = scalar_lea.vmem %s1633_s5, %s1144_s14 }
 0x18c   : > { %910 = vst [vmem:[%s892_s25] sm:$0x3] %v909_v63 }
 0x18d PF: > { %s12_s22 = sadd.s32 1, %s1256_s22   ;;  %s1643_s18 = smov %s1244_s19 }
 0x18e   : > { %p9_p12 = scmp.ge.s32.totalorder %s12_s22, 4   ;;  %s1644_s19 = smov %s1338_s9 }
 0x18f   : > { %s1645_s20 = smov %s1252_s21  ;;  %s1646_s21 = smov %s1648_s23 }
 0x190   :  { %11 = sbr.rel (!%p9_p12) target bundleno = 3 (0x3), region = 338 }

// kernel: custom-call.8
= control target key start
LH: loop header
LB: loop body
LE: loop exit
PB: predicated region body
PF: predicated region fallthrough
CT: control target
= control target key end

     0   :  { %s833_s12 = smov 0   ;;  %s1009_s0 = inlined_call_operand.vmem [shape: f32[2,16,16], index: 0, kind: input, shape index: {}]   ;;  %s1010_s1 = inlined_call_operand.vmem [shape: f32[2,16,16], index: 1, kind: input, shape index: {}]   ;;  %s1011_s2 = inlined_call_operand.vmem [shape: f32[2,16,16], index: 2, kind: output, shape index: {0}]   ;;  %s1012_s3 = inlined_call_operand.vmem [shape: f32[2,16,16], index: 3, kind: output, shape index: {1}]  }
   0x1 LB: > { %s745_s13 = sadd.s32 4294967295, %s810_s12   ;;  %p747_p0 = scmp.ge.s32.totalorder %s810_s12, 2  ;;  %s810_s12 = sphi %s833_s12, %s10_s12  }
   0x2   : > { %s26_s14 = sand.u32 (!%p747_p0), 1, %s810_s12   ;;  %s749_s15 = sshll.u32 (!%p747_p0), %s810_s12, 4 }
   0x3   : > { %24 = sbr.rel (%p747_p0) target bundleno = 11 (0xb), region = 16  ;;  %s748_s16 = sshll.u32 (!%p747_p0), %s26_s14, 4 }
   0x4   : > { %s30_s19 = scalar_lea.vmem (!%p747_p0), %s1009_s0, %s749_s15  ;;  %s28_s20 = scalar_lea.vmem (!%p747_p0), [#allocation0], %s748_s16 }
   0x5   : > { %s55_s23 = scalar_lea.vmem (!%p747_p0), %s1010_s1, %s749_s15  ;;  %s53_s24 = scalar_lea.vmem (!%p747_p0), [#allocation1], %s748_s16 }
   0x8   : > { %v43_v0 = vld [vmem:[%s30_s19] sm:$0xff]  ;;  %v45_v1 = vld [vmem:[%s30_s19 + $0x8] sm:$0xff] }
   0x9   : > { %44 = vst [vmem:[%s28_s20] sm:$0xff] %v43_v0  ;;  %46 = vst [vmem:[%s28_s20 + $0x8] sm:$0xff] %v45_v1  ;;  %v68_v2 = vld [vmem:[%s55_s23] sm:$0xff]  ;;  %v70_v3 = vld [vmem:[%s55_s23 + $0x8] sm:$0xff] }
   0xa   : > { %69 = vst [vmem:[%s53_s24] sm:$0xff] %v68_v2  ;;  %71 = vst [vmem:[%s53_s24 + $0x8] sm:$0xff] %v70_v3 }
   0xb PF: > { %p752_p1 = scmp.ge.s32.totalorder %s810_s12, 1  ;;  %p76_p2 = scmp.lt.s32.totalorder %s810_s12, 3 }
   0xd   : > { %p77_p3 = pnand %p752_p1, %p76_p2 }
   0xe   : > { %s83_s25 = sand.u32 (!%p77_p3), 1, %s745_s13   ;;  %s791_s29 = sshll.u32 (!%p77_p3), %s745_s13, 4 }
   0xf   : > { %80 = sbr.rel (%p77_p3) target bundleno = 2186 (0x88a), region = 58  ;;  %s753_s26 = sshll.u32 (!%p77_p3), %s83_s25, 4 }
  0x10   : > { %s856_s27 = scalar_lea.vmem (!%p77_p3), [#allocation0], %s753_s26  ;;  %s859_s28 = scalar_lea.vmem (!%p77_p3), [#allocation1], %s753_s26 }
  0x11   : > { %s659_s5 = scalar_lea.vmem (!%p77_p3), %s1012_s3, %s791_s29  ;;  %s638_s8 = scalar_lea.vmem (!%p77_p3), %s1011_s2, %s791_s29 }
  0x14   : > { %v106_v4 = vlaneseq  ;;  %vm132_vm0 = vcmask 130048   ;;  %v112_v7 = vld [vmem:[%s856_s27] sm:$0xff] }
  0x15   : > { %v113_v8 = vld [vmem:[%s859_s28] sm:$0xff] }
  0x16   : > { %v852_v5 = vand.u32 127, %v106_v4  ;;  %v854_v6 = vshrl.u32 %v106_v4, 7  ;;  %v757_v9 = vld [vmem:[%s856_s27 + $0x1] ss:$0 sm:$0xff]  ;;  %v759_v24 = vld [vmem:[%s856_s27 + $0x2] ss:$0 sm:$0xff] }
  0x17   : > { %v758_v10 = vld [vmem:[%s859_s28 + $0x1] ss:$0 sm:$0xff]  ;;  %v133_v11 = vsel %vm132_vm0, %v757_v9, 0.0  ;;  %v760_v25 = vld [vmem:[%s859_s28 + $0x2] ss:$0 sm:$0xff]  ;;  %v158_v27 = vsel %vm132_vm0, %v759_v24, 0.0 }
  0x18   : > { %vm111_vm1 = vcmp.eq.s32.totalorder %v852_v5, %v854_v6  ;;  %vm116_vm2 = vcmp.eq.s32.totalorder %v852_v5, 0  ;;  %v134_v14 = vsel %vm132_vm0, %v758_v10, 0.0  ;;  %vm137_vm3 = vcmp.eq.s32.totalorder %v852_v5, 1  ;;  %v761_v38 = vld [vmem:[%s856_s27 + $0x3] ss:$0 sm:$0xff] }
  0x19   : > { %v117_v12 = vsel %vm116_vm2, %v112_v7, 1.0  ;;  %v118_v13 = vsel %vm116_vm2, %v113_v8, 0.0  ;;  %v159_v30 = vsel %vm132_vm0, %v760_v25, 0.0  ;;  %vm162_vm4 = vcmp.eq.s32.totalorder %v852_v5, 2  ;;  %v762_v39 = vld [vmem:[%s859_s28 + $0x3] ss:$0 sm:$0xff] }
  0x1a   : > { %v119_v15 = vsel %vm111_vm1, %v117_v12, 0.0  ;;  %v120_v16 = vsel %vm111_vm1, %v118_v13, 0.0  ;;  %v183_v41 = vsel %vm132_vm0, %v761_v38, 0.0  ;;  %v184_v42 = vsel %vm132_vm0, %v762_v39, 0.0  ;;  %v763_v51 = vld [vmem:[%s856_s27 + $0x4] ss:$0 sm:$0xff] }
  0x1b   : > { %v140_v17 = vmul.f32 %v133_v11, %v119_v15  ;;  %v141_v18 = vmul.f32 %v134_v14, %v120_v16  ;;  %v143_v19 = vmul.f32 %v133_v11, %v120_v16  ;;  %v144_v20 = vmul.f32 %v134_v14, %v119_v15  ;;  %v764_v52 = vld [vmem:[%s859_s28 + $0x4] ss:$0 sm:$0xff]  ;;  %v765_v1 = vld [vmem:[%s856_s27 + $0x5] ss:$0 sm:$0xff] }
  0x1c   : > { %vm187_vm5 = vcmp.eq.s32.totalorder %v852_v5, 3  ;;  %v208_v53 = vsel %vm132_vm0, %v763_v51, 0.0  ;;  %v209_v54 = vsel %vm132_vm0, %v764_v52, 0.0  ;;  %v766_v2 = vld [vmem:[%s859_s28 + $0x5] ss:$0 sm:$0xff]  ;;  %vm212_vm6 = vcmp.eq.s32.totalorder %v852_v5, 4 }
  0x1d   : > { %v142_v21 = vsub.f32 %v140_v17, %v141_v18  ;;  %v145_v22 = vadd.f32 %v144_v20, %v143_v19  ;;  %v233_v3 = vsel %vm132_vm0, %v765_v1, 0.0  ;;  %v234_v4 = vsel %vm132_vm0, %v766_v2, 0.0  ;;  %v767_v17 = vld [vmem:[%s856_s27 + $0x6] ss:$0 sm:$0xff] }
  0x1e   : > { %v768_v18 = vld [vmem:[%s859_s28 + $0x6] ss:$0 sm:$0xff]  ;;  %vm237_vm7 = vcmp.eq.s32.totalorder %v852_v5, 5  ;;  %v258_v19 = vsel %vm132_vm0, %v767_v17, 0.0  ;;  %vm262_vm8 = vcmp.eq.s32.totalorder %v852_v5, 6  ;;  %vm287_vm10 = vcmp.eq.s32.totalorder %v852_v5, 7 }
  0x1f   : > { %147 = vadd.xlane.f32.xlu0 %v142_v21  ;;  %v259_v20 = vsel %vm132_vm0, %v768_v18, 0.0  ;;  %vm312_vm11 = vcmp.eq.s32.totalorder %v852_v5, 8  ;;  %vm352_vm12 = vcmp.eq.s32.totalorder %v852_v5, 9  ;;  %vm392_vm13 = vcmp.eq.s32.totalorder %v852_v5, 10 }
  0x20   : > { %vm432_vm14 = vcmp.eq.s32.totalorder %v852_v5, 11  ;;  %vm472_vm15 = vcmp.eq.s32.totalorder %v852_v5, 12  ;;  %vm512_vm1 = vcmp.eq.s32.totalorder %v852_v5, 13  ;;  %vm552_vm2 = vcmp.eq.s32.totalorder %v852_v5, 14 }
  0x23   : > { %149 = vadd.xlane.f32.xlu0 %v145_v22 }
  0xa8   : > { %v148_v23 = vpop.xlane.xlu0 %147 }
  0xa9   : > { %v151_v26 = vsel %vm137_vm3, %v148_v23, %v119_v15 }
  0xaa   : > { %v165_v31 = vmul.f32 %v158_v27, %v151_v26  ;;  %v169_v35 = vmul.f32 %v159_v30, %v151_v26 }
  0xac   : > { %v150_v28 = vpop.xlane.xlu0 %149 }
  0xad   : > { %v152_v29 = vsel %vm137_vm3, %v150_v28, %v120_v16 }
  0xae   : > { %v166_v32 = vmul.f32 %v159_v30, %v152_v29  ;;  %v168_v34 = vmul.f32 %v158_v27, %v152_v29 }
  0xb0   : > { %v167_v33 = vsub.f32 %v165_v31, %v166_v32  ;;  %v170_v36 = vadd.f32 %v169_v35, %v168_v34  ;;  %v769_v31 = vld [vmem:[%s856_s27 + $0x7] ss:$0 sm:$0xff] }
  0xb1   : > { %v770_v32 = vld [vmem:[%s859_s28 + $0x7] ss:$0 sm:$0xff] }
  0xb2   : > { %172 = vadd.xlane.f32.xlu1 %v167_v33  ;;  %v283_v33 = vsel %vm132_vm0, %v769_v31, 0.0  ;;  %v284_v34 = vsel %vm132_vm0, %v770_v32, 0.0 }
  0xb6   : > { %174 = vadd.xlane.f32.xlu1 %v170_v36 }
 0x13b   : > { %v173_v37 = vpop.xlane.xlu1 %172 }
 0x13c   : > { %v176_v40 = vsel %vm162_vm4, %v173_v37, %v151_v26 }
 0x13d   : > { %v194_v46 = vmul.f32 %v184_v42, %v176_v40  ;;  %v190_v47 = vmul.f32 %v183_v41, %v176_v40 }
 0x13f   : > { %v175_v43 = vpop.xlane.xlu1 %174 }
 0x140   : > { %v177_v44 = vsel %vm162_vm4, %v175_v43, %v152_v29 }
 0x141   : > { %v193_v45 = vmul.f32 %v183_v41, %v177_v44  ;;  %v191_v48 = vmul.f32 %v184_v42, %v177_v44 }
 0x143   : > { %v195_v49 = vadd.f32 %v194_v46, %v193_v45  ;;  %v192_v50 = vsub.f32 %v190_v47, %v191_v48  ;;  %v125_v45 = vadd.s32 8, %v854_v6  ;;  %v771_v46 = vld [vmem:[%s856_s27 + $0x8] ss:$0 sm:$0xff]  ;;  %v812_v48 = vmov 0.0  }
 0x144   : > { %v772_v47 = vld [vmem:[%s859_s28 + $0x8] ss:$0 sm:$0xff] }
 0x145   : > { %199 = vadd.xlane.f32.xlu1 %v195_v49  ;;  %197 = vadd.xlane.f32.xlu0 %v192_v50  ;;  %vm126_vm9 = vcmp.eq.s32.totalorder %v852_v5, %v125_v45  ;;  %v308_v50 = vsel %vm132_vm0, %v771_v46, 0.0  ;;  %v309_v51 = vsel %vm132_vm0, %v772_v47, 0.0 }
 0x146   : > { %v127_v49 = vsel %vm126_vm9, 1.0, %v812_v48 }
 0x147   : > { %v330_v6 = vmul.f32 %v308_v50, %v127_v49 }
 0x1ce   : > { %v200_v55 = vpop.xlane.xlu1 %199  ;;  %v198_v56 = vpop.xlane.xlu0 %197 }
 0x1cf   : > { %v202_v57 = vsel %vm187_vm5, %v200_v55, %v177_v44  ;;  %v201_v58 = vsel %vm187_vm5, %v198_v56, %v176_v40  ;;  %v334_v55 = vmul.f32 %v309_v51, %v127_v49 }
 0x1d0   : > { %v218_v59 = vmul.f32 %v208_v53, %v202_v57  ;;  %v219_v60 = vmul.f32 %v209_v54, %v201_v58  ;;  %v215_v61 = vmul.f32 %v208_v53, %v201_v58  ;;  %v216_v62 = vmul.f32 %v209_v54, %v202_v57 }
 0x1d1   : > { %v333_v54 = vmul.f32 0.0, %v308_v50 }
 0x1d2   : > { %v220_v63 = vadd.f32 %v219_v60, %v218_v59  ;;  %v217_v0 = vsub.f32 %v215_v61, %v216_v62 }
 0x1d3   : > { %v335_v1 = vadd.f32 %v334_v55, %v333_v54  ;;  %v778_v54 = vld [vmem:[%s859_s28 + $0xb] ss:$0 sm:$0xff] }
 0x1d4   : > { %224 = vadd.xlane.f32.xlu1 %v220_v63  ;;  %222 = vadd.xlane.f32.xlu0 %v217_v0 }
 0x25d   : > { %v225_v7 = vpop.xlane.xlu1 %224  ;;  %v223_v8 = vpop.xlane.xlu0 %222 }
 0x25e   : > { %v227_v9 = vsel %vm212_vm6, %v225_v7, %v202_v57  ;;  %v226_v10 = vsel %vm212_vm6, %v223_v8, %v201_v58  ;;  %v331_v58 = vmul.f32 0.0, %v309_v51 }
 0x25f   : > { %v243_v11 = vmul.f32 %v233_v3, %v227_v9  ;;  %v244_v12 = vmul.f32 %v234_v4, %v226_v10  ;;  %v240_v13 = vmul.f32 %v233_v3, %v226_v10  ;;  %v241_v14 = vmul.f32 %v234_v4, %v227_v9  ;;  %v773_v3 = vld [vmem:[%s856_s27 + $0x9] ss:$0 sm:$0xff] }
 0x260   : > { %v332_v2 = vsub.f32 %v330_v6, %v331_v58  ;;  %v774_v4 = vld [vmem:[%s859_s28 + $0x9] ss:$0 sm:$0xff]  ;;  %v348_v7 = vsel %vm132_vm0, %v773_v3, 0.0 }
 0x261   : > { %v245_v15 = vadd.f32 %v244_v12, %v243_v11  ;;  %v242_v16 = vsub.f32 %v240_v13, %v241_v14  ;;  %v349_v8 = vsel %vm132_vm0, %v774_v4, 0.0 }
 0x263   : > { %249 = vadd.xlane.f32.xlu1 %v245_v15  ;;  %247 = vadd.xlane.f32.xlu0 %v242_v16 }
 0x2ec   : > { %v250_v21 = vpop.xlane.xlu1 %249  ;;  %v248_v22 = vpop.xlane.xlu0 %247 }
 0x2ed   : > { %v252_v23 = vsel %vm237_vm7, %v250_v21, %v227_v9  ;;  %v251_v24 = vsel %vm237_vm7, %v248_v22, %v226_v10 }
 0x2ee   : > { %v268_v25 = vmul.f32 %v258_v19, %v252_v23  ;;  %v269_v26 = vmul.f32 %v259_v20, %v251_v24  ;;  %v265_v27 = vmul.f32 %v258_v19, %v251_v24  ;;  %v266_v28 = vmul.f32 %v259_v20, %v252_v23 }
 0x2f0   : > { %v270_v29 = vadd.f32 %v269_v26, %v268_v25  ;;  %v267_v30 = vsub.f32 %v265_v27, %v266_v28 }
 0x2f2   : > { %274 = vadd.xlane.f32.xlu1 %v270_v29  ;;  %272 = vadd.xlane.f32.xlu0 %v267_v30  ;;  %v775_v29 = vld [vmem:[%s856_s27 + $0xa] ss:$0 sm:$0xff] }
 0x2f3   : > { %v776_v30 = vld [vmem:[%s859_s28 + $0xa] ss:$0 sm:$0xff]  ;;  %v388_v31 = vsel %vm132_vm0, %v775_v29, 0.0 }
 0x2f4   : > { %v389_v32 = vsel %vm132_vm0, %v776_v30, 0.0 }
 0x37b   : > { %v275_v35 = vpop.xlane.xlu1 %274  ;;  %v273_v36 = vpop.xlane.xlu0 %272 }
 0x37c   : > { %v277_v37 = vsel %vm262_vm8, %v275_v35, %v252_v23  ;;  %v276_v38 = vsel %vm262_vm8, %v273_v36, %v251_v24 }
 0x37d   : > { %v293_v39 = vmul.f32 %v283_v33, %v277_v37  ;;  %v294_v40 = vmul.f32 %v284_v34, %v276_v38  ;;  %v290_v41 = vmul.f32 %v283_v33, %v276_v38  ;;  %v291_v42 = vmul.f32 %v284_v34, %v277_v37 }
 0x37f   : > { %v295_v43 = vadd.f32 %v294_v40, %v293_v39  ;;  %v292_v44 = vsub.f32 %v290_v41, %v291_v42 }
 0x381   : > { %299 = vadd.xlane.f32.xlu1 %v295_v43  ;;  %297 = vadd.xlane.f32.xlu0 %v292_v44 }
 0x40a   : > { %v300_v52 = vpop.xlane.xlu1 %299  ;;  %v298_v53 = vpop.xlane.xlu0 %297 }
 0x40b   : > { %v302_v56 = vsel %vm287_vm10, %v300_v52, %v277_v37  ;;  %v301_v57 = vsel %vm287_vm10, %v298_v53, %v276_v38  ;;  %v777_v53 = vld [vmem:[%s856_s27 + $0xb] ss:$0 sm:$0xff] }
 0x40c   : > { %v318_v59 = vmul.f32 %v308_v50, %v302_v56  ;;  %v319_v60 = vmul.f32 %v309_v51, %v301_v57  ;;  %v315_v61 = vmul.f32 %v308_v50, %v301_v57  ;;  %v316_v62 = vmul.f32 %v309_v51, %v302_v56 }
 0x40d   : > { %v428_v55 = vsel %vm132_vm0, %v777_v53, 0.0 }
 0x40e   : > { %v320_v63 = vadd.f32 %v319_v60, %v318_v59  ;;  %v317_v0 = vsub.f32 %v315_v61, %v316_v62 }
 0x410   : > { %324 = vadd.xlane.f32.xlu1 %v320_v63  ;;  %322 = vadd.xlane.f32.xlu0 %v317_v0 }
 0x414   : > { %339 = vadd.xlane.f32.xlu1 %v335_v1  ;;  %337 = vadd.xlane.f32.xlu0 %v332_v2 }
 0x499   : > { %v325_v9 = vpop.xlane.xlu1 %324  ;;  %v323_v10 = vpop.xlane.xlu0 %322 }
 0x49a   : > { %v327_v11 = vsel %vm312_vm11, %v325_v9, %v302_v56  ;;  %v326_v12 = vsel %vm312_vm11, %v323_v10, %v301_v57  ;;  %v429_v56 = vsel %vm132_vm0, %v778_v54, 0.0 }
 0x49b   : > { %v358_v13 = vmul.f32 %v348_v7, %v327_v11  ;;  %v359_v14 = vmul.f32 %v349_v8, %v326_v12  ;;  %v355_v15 = vmul.f32 %v348_v7, %v326_v12  ;;  %v356_v16 = vmul.f32 %v349_v8, %v327_v11 }
 0x49d   : > { %v340_v17 = vpop.xlane.xlu1 %339  ;;  %v338_v18 = vpop.xlane.xlu0 %337  ;;  %v360_v19 = vadd.f32 %v359_v14, %v358_v13  ;;  %v357_v20 = vsub.f32 %v355_v15, %v356_v16  ;;  %v779_v14 = vld [vmem:[%s856_s27 + $0xc] ss:$0 sm:$0xff] }
 0x49e   : > { %v342_v21 = vsel %vm312_vm11, %v340_v17, 0.0  ;;  %v341_v22 = vsel %vm312_vm11, %v338_v18, %v127_v49  ;;  %v780_v15 = vld [vmem:[%s859_s28 + $0xc] ss:$0 sm:$0xff]  ;;  %v468_v16 = vsel %vm132_vm0, %v779_v14, 0.0 }
 0x49f   : > { %v371_v23 = vmul.f32 %v349_v8, %v342_v21  ;;  %v373_v24 = vmul.f32 %v348_v7, %v342_v21  ;;  %364 = vadd.xlane.f32.xlu1 %v360_v19  ;;  %362 = vadd.xlane.f32.xlu0 %v357_v20  ;;  %v374_v25 = vmul.f32 %v349_v8, %v341_v22  ;;  %v469_v17 = vsel %vm132_vm0, %v780_v15, 0.0 }
 0x4a0   : > { %v370_v26 = vmul.f32 %v348_v7, %v341_v22 }
 0x4a1   : > { %v375_v27 = vadd.f32 %v374_v25, %v373_v24 }
 0x4a2   : > { %v372_v28 = vsub.f32 %v370_v26, %v371_v23 }
 0x4a3   : > { %379 = vadd.xlane.f32.xlu1 %v375_v27 }
 0x4a4   : > { %377 = vadd.xlane.f32.xlu0 %v372_v28 }
 0x528   : > { %v365_v33 = vpop.xlane.xlu1 %364  ;;  %v363_v34 = vpop.xlane.xlu0 %362 }
 0x529   : > { %v367_v35 = vsel %vm352_vm12, %v365_v33, %v327_v11  ;;  %v366_v36 = vsel %vm352_vm12, %v363_v34, %v326_v12 }
 0x52a   : > { %v398_v37 = vmul.f32 %v388_v31, %v367_v35  ;;  %v399_v38 = vmul.f32 %v389_v32, %v366_v36  ;;  %v395_v39 = vmul.f32 %v388_v31, %v366_v36  ;;  %v396_v40 = vmul.f32 %v389_v32, %v367_v35 }
 0x52c   : > { %v380_v41 = vpop.xlane.xlu1 %379  ;;  %v400_v42 = vadd.f32 %v399_v38, %v398_v37  ;;  %v397_v43 = vsub.f32 %v395_v39, %v396_v40  ;;  %v781_v38 = vld [vmem:[%s856_s27 + $0xd] ss:$0 sm:$0xff] }
 0x52d   : > { %v382_v44 = vsel %vm352_vm12, %v380_v41, %v342_v21  ;;  %v378_v45 = vpop.xlane.xlu0 %377  ;;  %v782_v39 = vld [vmem:[%s859_s28 + $0xd] ss:$0 sm:$0xff]  ;;  %v508_v40 = vsel %vm132_vm0, %v781_v38, 0.0 }
 0x52e   : > { %v381_v46 = vsel %vm352_vm12, %v378_v45, %v341_v22  ;;  %404 = vadd.xlane.f32.xlu1 %v400_v42  ;;  %402 = vadd.xlane.f32.xlu0 %v397_v43  ;;  %v413_v47 = vmul.f32 %v388_v31, %v382_v44  ;;  %v411_v48 = vmul.f32 %v389_v32, %v382_v44  ;;  %v509_v41 = vsel %vm132_vm0, %v782_v39, 0.0 }
 0x52f   : > { %v414_v49 = vmul.f32 %v389_v32, %v381_v46  ;;  %v410_v50 = vmul.f32 %v388_v31, %v381_v46 }
 0x531   : > { %v415_v51 = vadd.f32 %v414_v49, %v413_v47  ;;  %v412_v52 = vsub.f32 %v410_v50, %v411_v48 }
 0x533   : > { %419 = vadd.xlane.f32.xlu1 %v415_v51  ;;  %417 = vadd.xlane.f32.xlu0 %v412_v52 }
 0x5b7   : > { %v405_v57 = vpop.xlane.xlu1 %404  ;;  %v403_v6 = vpop.xlane.xlu0 %402 }
 0x5b8   : > { %v407_v58 = vsel %vm392_vm13, %v405_v57, %v367_v35  ;;  %v406_v59 = vsel %vm392_vm13, %v403_v6, %v366_v36 }
 0x5b9   : > { %v438_v60 = vmul.f32 %v428_v55, %v407_v58  ;;  %v439_v61 = vmul.f32 %v429_v56, %v406_v59  ;;  %v435_v62 = vmul.f32 %v428_v55, %v406_v59  ;;  %v436_v63 = vmul.f32 %v429_v56, %v407_v58 }
 0x5bb   : > { %v440_v0 = vadd.f32 %v439_v61, %v438_v60  ;;  %v437_v1 = vsub.f32 %v435_v62, %v436_v63  ;;  %v783_v61 = vld [vmem:[%s856_s27 + $0xe] ss:$0 sm:$0xff] }
 0x5bc   : > { %v420_v2 = vpop.xlane.xlu1 %419  ;;  %v418_v3 = vpop.xlane.xlu0 %417  ;;  %v784_v62 = vld [vmem:[%s859_s28 + $0xe] ss:$0 sm:$0xff]  ;;  %v548_v63 = vsel %vm132_vm0, %v783_v61, 0.0 }
 0x5bd   : > { %v422_v4 = vsel %vm392_vm13, %v420_v2, %v382_v44  ;;  %v421_v7 = vsel %vm392_vm13, %v418_v3, %v381_v46  ;;  %444 = vadd.xlane.f32.xlu1 %v440_v0  ;;  %442 = vadd.xlane.f32.xlu0 %v437_v1  ;;  %v549_v0 = vsel %vm132_vm0, %v784_v62, 0.0 }
 0x5be   : > { %v453_v8 = vmul.f32 %v428_v55, %v422_v4  ;;  %v454_v9 = vmul.f32 %v429_v56, %v421_v7  ;;  %v450_v10 = vmul.f32 %v428_v55, %v421_v7  ;;  %v451_v11 = vmul.f32 %v429_v56, %v422_v4 }
 0x5c0   : > { %v455_v12 = vadd.f32 %v454_v9, %v453_v8  ;;  %v452_v13 = vsub.f32 %v450_v10, %v451_v11 }
 0x5c2   : > { %459 = vadd.xlane.f32.xlu1 %v455_v12  ;;  %457 = vadd.xlane.f32.xlu0 %v452_v13 }
 0x646   : > { %v445_v18 = vpop.xlane.xlu1 %444  ;;  %v443_v19 = vpop.xlane.xlu0 %442 }
 0x647   : > { %v447_v20 = vsel %vm432_vm14, %v445_v18, %v407_v58  ;;  %v446_v21 = vsel %vm432_vm14, %v443_v19, %v406_v59 }
 0x648   : > { %v478_v22 = vmul.f32 %v468_v16, %v447_v20  ;;  %v479_v23 = vmul.f32 %v469_v17, %v446_v21  ;;  %v475_v24 = vmul.f32 %v468_v16, %v446_v21  ;;  %v476_v25 = vmul.f32 %v469_v17, %v447_v20 }
 0x64a   : > { %v480_v26 = vadd.f32 %v479_v23, %v478_v22  ;;  %v477_v27 = vsub.f32 %v475_v24, %v476_v25  ;;  %v785_v23 = vld [vmem:[%s856_s27 + $0xf] ss:$0 sm:$0xff] }
 0x64b   : > { %v460_v28 = vpop.xlane.xlu1 %459  ;;  %v458_v29 = vpop.xlane.xlu0 %457  ;;  %v786_v24 = vld [vmem:[%s859_s28 + $0xf] ss:$0 sm:$0xff]  ;;  %v588_v25 = vsel %vm132_vm0, %v785_v23, 0.0 }
 0x64c   : > { %v462_v30 = vsel %vm432_vm14, %v460_v28, %v422_v4  ;;  %v461_v31 = vsel %vm432_vm14, %v458_v29, %v421_v7  ;;  %484 = vadd.xlane.f32.xlu1 %v480_v26  ;;  %482 = vadd.xlane.f32.xlu0 %v477_v27  ;;  %v589_v26 = vsel %vm132_vm0, %v786_v24, 0.0  ;;  %vm592_vm0 = vcmp.eq.s32.totalorder %v852_v5, 15 }
 0x64d   : > { %v493_v32 = vmul.f32 %v468_v16, %v462_v30  ;;  %v494_v33 = vmul.f32 %v469_v17, %v461_v31  ;;  %v490_v34 = vmul.f32 %v468_v16, %v461_v31  ;;  %v491_v35 = vmul.f32 %v469_v17, %v462_v30 }
 0x64f   : > { %v495_v36 = vadd.f32 %v494_v33, %v493_v32  ;;  %v492_v37 = vsub.f32 %v490_v34, %v491_v35 }
 0x651   : > { %499 = vadd.xlane.f32.xlu1 %v495_v36  ;;  %497 = vadd.xlane.f32.xlu0 %v492_v37 }
 0x6d5   : > { %v485_v42 = vpop.xlane.xlu1 %484  ;;  %v483_v43 = vpop.xlane.xlu0 %482 }
 0x6d6   : > { %v487_v44 = vsel %vm472_vm15, %v485_v42, %v447_v20  ;;  %v486_v45 = vsel %vm472_vm15, %v483_v43, %v446_v21 }
 0x6d7   : > { %v518_v46 = vmul.f32 %v508_v40, %v487_v44  ;;  %v519_v47 = vmul.f32 %v509_v41, %v486_v45  ;;  %v515_v48 = vmul.f32 %v508_v40, %v486_v45  ;;  %v516_v49 = vmul.f32 %v509_v41, %v487_v44 }
 0x6d9   : > { %v520_v50 = vadd.f32 %v519_v47, %v518_v46  ;;  %v517_v51 = vsub.f32 %v515_v48, %v516_v49 }
 0x6da   : > { %v500_v52 = vpop.xlane.xlu1 %499  ;;  %v498_v53 = vpop.xlane.xlu0 %497 }
 0x6db   : > { %v502_v54 = vsel %vm472_vm15, %v500_v52, %v462_v30  ;;  %v501_v55 = vsel %vm472_vm15, %v498_v53, %v461_v31  ;;  %524 = vadd.xlane.f32.xlu1 %v520_v50  ;;  %522 = vadd.xlane.f32.xlu0 %v517_v51 }
 0x6dc   : > { %v533_v56 = vmul.f32 %v508_v40, %v502_v54  ;;  %v534_v57 = vmul.f32 %v509_v41, %v501_v55  ;;  %v530_v6 = vmul.f32 %v508_v40, %v501_v55  ;;  %v531_v58 = vmul.f32 %v509_v41, %v502_v54 }
 0x6de   : > { %v535_v59 = vadd.f32 %v534_v57, %v533_v56  ;;  %v532_v60 = vsub.f32 %v530_v6, %v531_v58 }
 0x6e0   : > { %539 = vadd.xlane.f32.xlu1 %v535_v59  ;;  %537 = vadd.xlane.f32.xlu0 %v532_v60 }
 0x764   : > { %v525_v1 = vpop.xlane.xlu1 %524  ;;  %v523_v2 = vpop.xlane.xlu0 %522 }
 0x765   : > { %v527_v3 = vsel %vm512_vm1, %v525_v1, %v487_v44  ;;  %v526_v4 = vsel %vm512_vm1, %v523_v2, %v486_v45 }
 0x766   : > { %v558_v7 = vmul.f32 %v548_v63, %v527_v3  ;;  %v559_v8 = vmul.f32 %v549_v0, %v526_v4  ;;  %v555_v9 = vmul.f32 %v548_v63, %v526_v4  ;;  %v556_v10 = vmul.f32 %v549_v0, %v527_v3 }
 0x768   : > { %v560_v11 = vadd.f32 %v559_v8, %v558_v7  ;;  %v557_v12 = vsub.f32 %v555_v9, %v556_v10 }
 0x769   : > { %v540_v13 = vpop.xlane.xlu1 %539  ;;  %v538_v14 = vpop.xlane.xlu0 %537 }
 0x76a   : > { %v542_v15 = vsel %vm512_vm1, %v540_v13, %v502_v54  ;;  %v541_v16 = vsel %vm512_vm1, %v538_v14, %v501_v55  ;;  %564 = vadd.xlane.f32.xlu1 %v560_v11  ;;  %562 = vadd.xlane.f32.xlu0 %v557_v12 }
 0x76b   : > { %v573_v17 = vmul.f32 %v548_v63, %v542_v15  ;;  %v574_v18 = vmul.f32 %v549_v0, %v541_v16  ;;  %v570_v19 = vmul.f32 %v548_v63, %v541_v16  ;;  %v571_v20 = vmul.f32 %v549_v0, %v542_v15 }
 0x76d   : > { %v575_v21 = vadd.f32 %v574_v18, %v573_v17  ;;  %v572_v22 = vsub.f32 %v570_v19, %v571_v20 }
 0x76f   : > { %579 = vadd.xlane.f32.xlu1 %v575_v21  ;;  %577 = vadd.xlane.f32.xlu0 %v572_v22 }
 0x7f3   : > { %v565_v27 = vpop.xlane.xlu1 %564  ;;  %v563_v28 = vpop.xlane.xlu0 %562 }
 0x7f4   : > { %v567_v29 = vsel %vm552_vm2, %v565_v27, %v527_v3  ;;  %v566_v30 = vsel %vm552_vm2, %v563_v28, %v526_v4 }
 0x7f5   : > { %v598_v31 = vmul.f32 %v588_v25, %v567_v29  ;;  %v599_v32 = vmul.f32 %v589_v26, %v566_v30  ;;  %v595_v33 = vmul.f32 %v588_v25, %v566_v30  ;;  %v596_v34 = vmul.f32 %v589_v26, %v567_v29 }
 0x7f7   : > { %v600_v35 = vadd.f32 %v599_v32, %v598_v31  ;;  %v597_v36 = vsub.f32 %v595_v33, %v596_v34 }
 0x7f8   : > { %v580_v37 = vpop.xlane.xlu1 %579  ;;  %v578_v38 = vpop.xlane.xlu0 %577 }
 0x7f9   : > { %v582_v39 = vsel %vm552_vm2, %v580_v37, %v542_v15  ;;  %v581_v40 = vsel %vm552_vm2, %v578_v38, %v541_v16  ;;  %604 = vadd.xlane.f32.xlu1 %v600_v35  ;;  %602 = vadd.xlane.f32.xlu0 %v597_v36 }
 0x7fa   : > { %v613_v41 = vmul.f32 %v588_v25, %v582_v39  ;;  %v614_v42 = vmul.f32 %v589_v26, %v581_v40  ;;  %v610_v43 = vmul.f32 %v588_v25, %v581_v40  ;;  %v611_v44 = vmul.f32 %v589_v26, %v582_v39 }
 0x7fc   : > { %v615_v45 = vadd.f32 %v614_v42, %v613_v41  ;;  %v612_v46 = vsub.f32 %v610_v43, %v611_v44 }
 0x7fe   : > { %619 = vadd.xlane.f32.xlu1 %v615_v45  ;;  %617 = vadd.xlane.f32.xlu0 %v612_v46 }
 0x882   : > { %v605_v47 = vpop.xlane.xlu1 %604  ;;  %v603_v48 = vpop.xlane.xlu0 %602 }
 0x883   : > { %v607_v49 = vsel %vm592_vm0, %v605_v47, %v567_v29  ;;  %v606_v50 = vsel %vm592_vm0, %v603_v48, %v566_v30 }
 0x884   : > { %673 = vst [vmem:[%s659_s5] sm:$0xff] %v607_v49  ;;  %652 = vst [vmem:[%s638_s8] sm:$0xff] %v606_v50 }
 0x887   : > { %v620_v51 = vpop.xlane.xlu1 %619  ;;  %v618_v52 = vpop.xlane.xlu0 %617 }
 0x888   : > { %v622_v53 = vsel %vm592_vm0, %v620_v51, %v582_v39  ;;  %v621_v54 = vsel %vm592_vm0, %v618_v52, %v581_v40 }
 0x889   : > { %675 = vst [vmem:[%s659_s5 + $0x8] sm:$0xff] %v622_v53  ;;  %654 = vst [vmem:[%s638_s8 + $0x8] sm:$0xff] %v621_v54 }
 0x88a PF: > { %s10_s12 = sadd.s32 1, %s810_s12  }
 0x88b   : > { %p7_p4 = scmp.ge.s32.totalorder %s10_s12, 4  }
 0x88d   :  { %9 = sbr.rel (!%p7_p4) target bundleno = 1 (0x1), region = 174 }

// kernel: modu_network_forward.1
= control target key start
LH: loop header
LB: loop body
LE: loop exit
PB: predicated region body
PF: predicated region fallthrough
CT: control target
= control target key end

     0   :  { %16 = vsyncpa [#allocation3], 0  ;;  %s1619_s0 = inlined_call_operand.vmem [shape: bf16[16,384], index: 0, kind: input, shape index: {}]   ;;  %s1620_s1 = inlined_call_operand.hbm [shape: bf16[384,128], index: 1, kind: input, shape index: {}]   ;;  %s1621_s2 = inlined_call_operand.vmem [shape: f32[1,128], index: 2, kind: input, shape index: {}]   ;;  %s1622_s3 = inlined_call_operand.vmem [shape: f32[1,128], index: 3, kind: input, shape index: {}]   ;;  %s1623_s4 = inlined_call_operand.hbm [shape: bf16[128,128], index: 4, kind: input, shape index: {}]   ;;  %s1624_s5 = inlined_call_operand.vmem [shape: f32[1,128], index: 5, kind: input, shape index: {}]   ;;  %s1625_s6 = inlined_call_operand.hbm [shape: bf16[128,128], index: 6, kind: input, shape index: {}]   ;;  %s1626_s7 = inlined_call_operand.vmem [shape: f32[1,128], index: 7, kind: input, shape index: {}]   ;;  %s1627_s8 = inlined_call_operand.vmem [shape: bf16[128,512], index: 8, kind: input, shape index: {}]   ;;  %s1628_s9 = inlined_call_operand.vmem [shape: f32[1,512], index: 9, kind: input, shape index: {}]   ;;  %s1629_s10 = inlined_call_operand.vmem [shape: f32[1,512], index: 10, kind: input, shape index: {}]   ;;  %s1630_s11 = inlined_call_operand.vmem [shape: f32[16,512], index: 11, kind: output, shape index: {}]  }
   0x1   :  { %17 = vsyncpa [#allocation5], 0  ;;  %s1365_s17 = smov [#allocation4]   ;;  %s1366_s19 = smov [#allocation2]  }
   0x2   :  { %s41_s18 = sshll.u32 %s1365_s17, 4  ;;  %s25_s20 = sshll.u32 %s1366_s19, 4  ;;  %s42_s18 = int_to_ptr.vmem [resolvable:$true] %s41_s18  ;;  %s26_s20 = int_to_ptr.vmem [resolvable:$true] %s25_s20 }
   0x3   :  { %s1309_s21 = scalar_lea.vmem %s42_s18, 1024  ;;  %p1314_p1 = scmp.lt.s32.totalorder %s42_s18, %s42_s18 }
   0x4   :  { %p1310_p0 = scmp.ne.s32.totalorder %s42_s18, %s1309_s21  ;;  %p1315_p2 = scmp.lt.s32.totalorder %s1309_s21, %s1309_s21 }
   0x6   :  { %p1316_p3 = por %p1315_p2, %p1314_p1 }
   0x8   :  { %p1317_p4 = pnand %p1316_p3, %p1310_p0 }
   0xa   :  { %1320 = shalt.err (!%p1317_p4)
}
   0xb   :  { %s1367_s22 = smov 64   ;;  %s1368_s23 = smov 4  }
   0xc   :  { %47 = dma.hbm_to_vmem [thread:$0]  %s1623_s4, 1024, %s42_s18, [#allocation5], %s1367_s22, %s1367_s22, %s1368_s23  }
   0xd   :  { %s1329_s26 = scalar_lea.vmem %s26_s20, 3072  ;;  %p1334_p6 = scmp.lt.s32.totalorder %s26_s20, %s26_s20 }
   0xe   :  { %p1330_p5 = scmp.ne.s32.totalorder %s26_s20, %s1329_s26  ;;  %p1335_p7 = scmp.lt.s32.totalorder %s1329_s26, %s1329_s26 }
  0x10   :  { %p1336_p8 = por %p1335_p7, %p1334_p6 }
  0x12   :  { %p1337_p9 = pnand %p1336_p8, %p1330_p5 }
  0x14   :  { %1340 = shalt.err (!%p1337_p9)
}
  0x15   :  { %31 = dma.hbm_to_vmem [thread:$0]  %s1620_s1, 3072, %s26_s20, [#allocation3], %s1367_s22, %s1367_s22, %s1368_s23  }
  0x16   :  { %s1369_s29 = smov [#allocation6]  }
  0x17   :  { %s55_s30 = sshll.u32 %s1369_s29, 4  ;;  %s56_s30 = int_to_ptr.vmem [resolvable:$true] %s55_s30 }
  0x18   :  { %s1349_s12 = scalar_lea.vmem %s56_s30, 1024  ;;  %p1354_p11 = scmp.lt.s32.totalorder %s56_s30, %s56_s30 }
  0x19   :  { %p1350_p10 = scmp.ne.s32.totalorder %s56_s30, %s1349_s12  ;;  %p1355_p12 = scmp.lt.s32.totalorder %s1349_s12, %s1349_s12 }
  0x1b   :  { %p1356_p13 = por %p1355_p12, %p1354_p11 }
  0x1d   :  { %p1357_p0 = pnand %p1356_p13, %p1350_p10 }
  0x1f   :  { %1360 = shalt.err (!%p1357_p0)
}
  0x20   :  { %61 = dma.hbm_to_vmem [thread:$0]  %s1625_s6, 1024, %s56_s30, [#allocation5], %s1367_s22, %s1367_s22, %s1368_s23  }
  0x21   :  { %1361 = dma.done.wait [#allocation3], 3072  }
  0x22   :  { %1362 = vsyncadd [#allocation3], 4294964224 }
  0x23   :  { %1363 = dma.done.wait [#allocation5], 2048  }
  0x24   :  { %1364 = vsyncadd [#allocation5], 4294965248  ;;  %v1370_v0 = vmov 0.0   ;;  %vm1371_vm0 = vmmov 0   ;;  %v1197_v1 = vld [vmem:[#allocation2 + $0x78] sm:$0xff]   ;;  %v1200_v4 = vld [vmem:[#allocation2 + $0x70] sm:$0xff]  }
  0x25   :  { %1129 = vmatprep.subr.bf16.mxu1 %v1370_v0  ;;  %1145 = vmatprep.mubr.msk.bf16.mxu1 %vm1371_vm0, %v1370_v0  ;;  %v1198_v2 = vld [vmem:[#allocation2 + $0xb8] sm:$0xff]   ;;  %v1201_v5 = vld [vmem:[#allocation2 + $0xb0] sm:$0xff]   ;;  %v1203_v7 = vld [vmem:[#allocation2 + $0x68] sm:$0xff]  }
  0x26   :  { %1080 = vmatprep.subr.bf16.mxu0 %v1197_v1  ;;  %v1199_v3 = vld [vmem:[#allocation2 + $0x38] sm:$0xff]   ;;  %1130 = vmatpush3.bf16.msra.mxu1 %v1198_v2  ;;  %v1202_v6 = vld [vmem:[#allocation2 + $0x30] sm:$0xff]   ;;  %v1204_v8 = vld [vmem:[#allocation2 + $0xa8] sm:$0xff]  }
  0x27   :  { %1081 = vmatpush3.bf16.msra.mxu0 %v1199_v3  ;;  %1131 = vmatprep.subr.bf16.mxu1 %v1370_v0  ;;  %v1205_v9 = vld [vmem:[#allocation2 + $0x28] sm:$0xff]   ;;  %v1206_v10 = vld [vmem:[#allocation2 + $0x60] sm:$0xff]   ;;  %v1209_v13 = vld [vmem:[#allocation2 + $0x58] sm:$0xff]  }
  0x28   :  { %1082 = vmatprep.subr.bf16.mxu0 %v1200_v4  ;;  %v1207_v11 = vld [vmem:[#allocation2 + $0xa0] sm:$0xff]   ;;  %v1210_v14 = vld [vmem:[#allocation2 + $0x98] sm:$0xff]   ;;  %v1212_v16 = vld [vmem:[#allocation2 + $0x50] sm:$0xff]  }
  0x29   :  { %v1208_v12 = vld [vmem:[#allocation2 + $0x20] sm:$0xff]   ;;  %v1211_v15 = vld [vmem:[#allocation2 + $0x18] sm:$0xff]   ;;  %v1213_v17 = vld [vmem:[#allocation2 + $0x90] sm:$0xff]  }
  0x2a   :  { %1132 = vmatpush3.bf16.msra.mxu1 %v1201_v5  ;;  %v1214_v18 = vld [vmem:[#allocation2 + $0x10] sm:$0xff]   ;;  %v1215_v19 = vld [vmem:[#allocation2 + $0x48] sm:$0xff]   ;;  %v1218_v22 = vld [vmem:[#allocation2 + $0x40] sm:$0xff]  }
  0x2b   :  { %1083 = vmatpush3.bf16.msra.mxu0 %v1202_v6  ;;  %1133 = vmatprep.subr.bf16.mxu1 %v1370_v0  ;;  %v1216_v20 = vld [vmem:[#allocation2 + $0x88] sm:$0xff]   ;;  %v1219_v23 = vld [vmem:[#allocation2 + $0x80] sm:$0xff]   ;;  %v1225_v28 = vld [vmem:[#allocation4 + $0x38] sm:$0xff]  }
  0x2c   :  { %1084 = vmatprep.subr.bf16.mxu0 %v1203_v7  ;;  %v1217_v21 = vld [vmem:[#allocation2 + $0x8] sm:$0xff]   ;;  %v1223_v24 = vld [vmem:[%s1619_s0 + $0x4] ss:$12 sps:$4 sm:$0xff]   ;;  %v1229_v32 = vld [vmem:[#allocation4 + $0x18] sm:$0xff]  }
  0x2d   :  { %v1220_v25 = vld [vmem:[#allocation2] sm:$0xff]   ;;  %324 = vmatprep.mubr.bf16.mxu0 %v1223_v24  ;;  %v1224_v26 = vld [vmem:[%s1619_s0 + $0x8] ss:$12 sps:$4 sm:$0xff]   ;;  %v1233_v36 = vld [vmem:[#allocation6 + $0x38] sm:$0xff]  }
  0x2e   :  { %1134 = vmatpush3.bf16.msra.mxu1 %v1204_v8  ;;  %v1221_v27 = vld [vmem:[%s1619_s0] ss:$12 sps:$4 sm:$0xff]   ;;  %v1226_v29 = vld [vmem:[#allocation4 + $0x30] sm:$0xff]   ;;  %v1237_v6 = vld [vmem:[#allocation6 + $0x18] sm:$0xff]  }
  0x2f   :  { %1085 = vmatpush3.bf16.msra.mxu0 %v1205_v9  ;;  %1135 = vmatprep.subr.bf16.mxu1 %v1370_v0  ;;  %v1227_v30 = vld [vmem:[#allocation4 + $0x28] sm:$0xff]   ;;  %v1228_v31 = vld [vmem:[#allocation4 + $0x20] sm:$0xff]   ;;  %v1230_v33 = vld [vmem:[#allocation4 + $0x10] sm:$0xff]  }
  0x30   :  { %1086 = vmatprep.subr.bf16.mxu0 %v1206_v10  ;;  %v1231_v34 = vld [vmem:[#allocation4 + $0x8] sm:$0xff]   ;;  %v1232_v35 = vld [vmem:[#allocation4] sm:$0xff]   ;;  %v1234_v3 = vld [vmem:[#allocation6 + $0x30] sm:$0xff]  }
  0x31   :  { %v1028_v43 = vld [vmem:[%s1621_s2] ss:$0 sm:$0xff]  ;;  %v1235_v4 = vld [vmem:[#allocation6 + $0x28] sm:$0xff]   ;;  %v1238_v7 = vld [vmem:[#allocation6 + $0x10] sm:$0xff]  }
  0x32   :  { %1136 = vmatpush3.bf16.msra.mxu1 %v1207_v11  ;;  %v1029_v47 = vld [vmem:[%s1622_s3] ss:$0 sm:$0xff]  ;;  %v1239_v8 = vld [vmem:[#allocation6 + $0x8] sm:$0xff]   ;;  %v1243_v11 = vld [vmem:[%s1627_s8 + $0xe4] ss:$16 sps:$4 sm:$0xff]  }
  0x33   :  { %1087 = vmatpush3.bf16.msra.mxu0 %v1208_v12  ;;  %1137 = vmatprep.subr.bf16.mxu1 %v1370_v0  ;;  %v1236_v5 = vld [vmem:[#allocation6 + $0x20] sm:$0xff]   ;;  %v1246_v12 = vld [vmem:[%s1627_s8 + $0xec] ss:$16 sps:$4 sm:$0xff]  }
  0x34   :  { %1088 = vmatprep.subr.bf16.mxu0 %v1209_v13  ;;  %v1240_v9 = vld [vmem:[#allocation6] sm:$0xff]  }
  0x35   :  { %v1241_v10 = vld [vmem:[%s1627_s8 + $0xe0] ss:$16 sps:$4 sm:$0xff]  }
  0x36   :  { %1138 = vmatpush3.bf16.msra.mxu1 %v1210_v14 }
  0x37   :  { %1089 = vmatpush3.bf16.msra.mxu0 %v1211_v15  ;;  %1139 = vmatprep.subr.bf16.mxu1 %v1370_v0 }
  0x38   :  { %1090 = vmatprep.subr.bf16.mxu0 %v1212_v16 }
  0x3a   :  { %1140 = vmatpush3.bf16.msra.mxu1 %v1213_v17 }
  0x3b   :  { %1091 = vmatpush3.bf16.msra.mxu0 %v1214_v18  ;;  %1141 = vmatprep.subr.bf16.mxu1 %v1370_v0 }
  0x3c   :  { %1092 = vmatprep.subr.bf16.mxu0 %v1215_v19 }
  0x3e   :  { %1142 = vmatpush3.bf16.msra.mxu1 %v1216_v20 }
  0x3f   :  { %1093 = vmatpush3.bf16.msra.mxu0 %v1217_v21  ;;  %1143 = vmatprep.subr.bf16.mxu1 %v1370_v0 }
  0x40   :  { %1094 = vmatprep.subr.bf16.mxu0 %v1218_v22 }
  0x42   :  { %1144 = vmatpush3.bf16.msra.mxu1 %v1219_v23 }
  0x43   :  { %1095 = vmatpush3.bf16.msra.mxu0 %v1220_v25  ;;  %1169 = vmatprep.subr.bf16.mxu1 %v1370_v0 }
  0x44   :  { %1149 = vmatprep.subr.bf16.mxu0 %v1370_v0 }
  0x45   :  { %1146 = vmatmul.mubr.bf16.vlgmr.msra.gmra.mxu1 %v1224_v26 }
  0x46   :  { %325 = vmatmul.mubr.bf16.vlgmr.msra.gmra.mxu0 %v1221_v27  ;;  %1185 = vmatprep.mubr.msk.bf16.mxu1 %vm1371_vm0, %v1370_v0 }
  0x47   :  { %1165 = vmatprep.mubr.msk.bf16.mxu0 %vm1371_vm0, %v1370_v0  ;;  %1150 = vmatpush3.bf16.msra.mxu0 %v1225_v28 }
  0x48   :  { %1151 = vmatprep.subr.bf16.mxu0 %v1370_v0  ;;  %1170 = vmatpush3.bf16.msra.mxu1 %v1233_v36  ;;  %v1258_v36 = vld [vmem:[%s1627_s8 + $0xac] ss:$16 sps:$4 sm:$0xff]  }
  0x49   :  { %1171 = vmatprep.subr.bf16.mxu1 %v1370_v0 }
  0x4b   :  { %1152 = vmatpush3.bf16.msra.mxu0 %v1226_v29  ;;  %v1244_v29 = vld [vmem:[%s1627_s8 + $0xe8] ss:$16 sps:$4 sm:$0xff]  }
  0x4c   :  { %1153 = vmatprep.subr.bf16.mxu0 %v1370_v0  ;;  %1172 = vmatpush3.bf16.msra.mxu1 %v1234_v3 }
  0x4d   :  { %1173 = vmatprep.subr.bf16.mxu1 %v1370_v0 }
  0x4f   :  { %1154 = vmatpush3.bf16.msra.mxu0 %v1227_v30 }
  0x50   :  { %1155 = vmatprep.subr.bf16.mxu0 %v1370_v0  ;;  %1174 = vmatpush3.bf16.msra.mxu1 %v1235_v4 }
  0x51   :  { %1175 = vmatprep.subr.bf16.mxu1 %v1370_v0 }
  0x53   :  { %1156 = vmatpush3.bf16.msra.mxu0 %v1228_v31  ;;  %v1249_v31 = vld [vmem:[%s1627_s8 + $0xc4] ss:$16 sps:$4 sm:$0xff]  }
  0x54   :  { %1157 = vmatprep.subr.bf16.mxu0 %v1370_v0  ;;  %1176 = vmatpush3.bf16.msra.mxu1 %v1236_v5 }
  0x55   :  { %1177 = vmatprep.subr.bf16.mxu1 %v1370_v0 }
  0x57   :  { %1158 = vmatpush3.bf16.msra.mxu0 %v1229_v32  ;;  %v1252_v32 = vld [vmem:[%s1627_s8 + $0xcc] ss:$16 sps:$4 sm:$0xff]  }
  0x58   :  { %1159 = vmatprep.subr.bf16.mxu0 %v1370_v0  ;;  %1178 = vmatpush3.bf16.msra.mxu1 %v1237_v6 }
  0x59   :  { %1179 = vmatprep.subr.bf16.mxu1 %v1370_v0 }
  0x5b   :  { %1160 = vmatpush3.bf16.msra.mxu0 %v1230_v33  ;;  %v1247_v33 = vld [vmem:[%s1627_s8 + $0xc0] ss:$16 sps:$4 sm:$0xff]  }
  0x5c   :  { %1161 = vmatprep.subr.bf16.mxu0 %v1370_v0  ;;  %1180 = vmatpush3.bf16.msra.mxu1 %v1238_v7 }
  0x5d   :  { %1181 = vmatprep.subr.bf16.mxu1 %v1370_v0 }
  0x5f   :  { %1162 = vmatpush3.bf16.msra.mxu0 %v1231_v34  ;;  %v1250_v34 = vld [vmem:[%s1627_s8 + $0xc8] ss:$16 sps:$4 sm:$0xff]  }
  0x60   :  { %1163 = vmatprep.subr.bf16.mxu0 %v1370_v0  ;;  %1182 = vmatpush3.bf16.msra.mxu1 %v1239_v8 }
  0x61   :  { %1183 = vmatprep.subr.bf16.mxu1 %v1370_v0  ;;  %v1030_v0 = vld [vmem:[%s1624_s5] ss:$0 sm:$0xff] }
  0x63   :  { %1164 = vmatpush3.bf16.msra.mxu0 %v1232_v35  ;;  %v1255_v35 = vld [vmem:[%s1627_s8 + $0xa4] ss:$16 sps:$4 sm:$0xff]  }
  0x64   :  { %1184 = vmatpush3.bf16.msra.mxu1 %v1240_v9  ;;  %841 = vmatprep.subr.bf16.mxu0 %v1243_v11 }
  0x65   :  { %884 = vmatprep.subr.bf16.mxu1 %v1246_v12 }
 0x105   :  { %v367_v37 = vpop.f32.mrf.mxu1 }
 0x106   :  { %v1096_v38 = vpop.f32.mrf.mxu0 }
 0x107   :  { %v1147_v39 = vpop.f32.mrf.mxu1 }
 0x108   :  { %v1097_v40 = vpop.f32.mrf.mxu0  ;;  %v1261_v39 = vld [vmem:[%s1627_s8 + $0x84] ss:$16 sps:$4 sm:$0xff]  }
 0x109   :  { %v1098_v41 = vadd.f32 %v1097_v40, %v1096_v38  ;;  %v370_v42 = vpop.f32.mrf.mxu1  ;;  %v1256_v38 = vld [vmem:[%s1627_s8 + $0xa8] ss:$16 sps:$4 sm:$0xff]   ;;  %v1264_v40 = vld [vmem:[%s1627_s8 + $0x8c] ss:$16 sps:$4 sm:$0xff]  }
 0x10a   :  { %v1099_v44 = vpop.f32.mrf.mxu0 }
 0x10b   :  { %v368_v45 = vadd.f32 %v1098_v41, %v367_v37  ;;  %v1148_v46 = vpop.f32.mrf.mxu1  ;;  %v1253_v37 = vld [vmem:[%s1627_s8 + $0xa0] ss:$16 sps:$4 sm:$0xff]  }
 0x10c   :  { %v1100_v48 = vpop.f32.mrf.mxu0  ;;  %v1259_v41 = vld [vmem:[%s1627_s8 + $0x80] ss:$16 sps:$4 sm:$0xff]   ;;  %v1268_v46 = vld [vmem:[%s1627_s8 + $0x68] ss:$16 sps:$4 sm:$0xff]  }
 0x10d   :  { %v381_v49 = vmul.f32 %v1028_v43, %v368_v45  ;;  %v1101_v50 = vadd.f32 %v1100_v48, %v1099_v44  ;;  %v1270_v44 = vld [vmem:[%s1627_s8 + $0x6c] ss:$16 sps:$4 sm:$0xff]   ;;  %v1265_v45 = vld [vmem:[%s1627_s8 + $0x60] ss:$16 sps:$4 sm:$0xff]  }
 0x10e   :  { %v1276_v48 = vld [vmem:[%s1627_s8 + $0x4c] ss:$16 sps:$4 sm:$0xff]  }
 0x10f   :  { %v390_v51 = vadd.f32 %v1029_v47, %v381_v49  ;;  %v371_v52 = vadd.f32 %v1101_v50, %v370_v42  ;;  %v1262_v42 = vld [vmem:[%s1627_s8 + $0x88] ss:$16 sps:$4 sm:$0xff]   ;;  %v1271_v49 = vld [vmem:[%s1627_s8 + $0x40] ss:$16 sps:$4 sm:$0xff]  }
 0x110   :  { %v1274_v50 = vld [vmem:[%s1627_s8 + $0x48] ss:$16 sps:$4 sm:$0xff]  }
 0x111   :  { %v394_v53 = vmul.f32 0.70710677, %v390_v51  ;;  %v382_v54 = vmul.f32 %v1028_v43, %v371_v52  ;;  %v392_v60 = vmul.f32 0.5, %v390_v51  ;;  %v1267_v43 = vld [vmem:[%s1627_s8 + $0x64] ss:$16 sps:$4 sm:$0xff]  }
 0x112   :  { %v1279_v51 = vld [vmem:[%s1627_s8 + $0x24] ss:$16 sps:$4 sm:$0xff]   ;;  %v1282_v52 = vld [vmem:[%s1627_s8 + $0x2c] ss:$16 sps:$4 sm:$0xff]  }
 0x113   :  { %1289 = verf.f32 %v394_v53  ;;  %v391_v55 = vadd.f32 %v1029_v47, %v382_v54  ;;  %v1273_v47 = vld [vmem:[%s1627_s8 + $0x44] ss:$16 sps:$4 sm:$0xff]   ;;  %v1277_v53 = vld [vmem:[%s1627_s8 + $0x20] ss:$16 sps:$4 sm:$0xff]   ;;  %v1280_v54 = vld [vmem:[%s1627_s8 + $0x28] ss:$16 sps:$4 sm:$0xff]  }
 0x115   :  { %v395_v56 = vmul.f32 0.70710677, %v391_v55  ;;  %v393_v61 = vmul.f32 0.5, %v391_v55  ;;  %v1285_v55 = vld [vmem:[%s1627_s8 + $0x4] ss:$16 sps:$4 sm:$0xff]  }
 0x117   :  { %1291 = verf.f32 %v395_v56  ;;  %v1288_v56 = vld [vmem:[%s1627_s8 + $0xc] ss:$16 sps:$4 sm:$0xff]  }
 0x120   :  { %v1290_v57 = vpop.eup %1289 }
 0x121   :  { %v398_v58 = vadd.f32 1.0, %v1290_v57  ;;  %v1283_v57 = vld [vmem:[%s1627_s8] ss:$16 sps:$4 sm:$0xff]  }
 0x123   :  { %v400_v63 = vmul.f32 %v398_v58, %v392_v60  ;;  %v1286_v58 = vld [vmem:[%s1627_s8 + $0x8] ss:$16 sps:$4 sm:$0xff]   ;;  %v1039_v60 = vld [vmem:[%s1626_s7] ss:$0 sm:$0xff] }
 0x124   :  { %v1292_v59 = vpop.eup %1291 }
 0x125   :  { %v399_v62 = vadd.f32 1.0, %v1292_v59  ;;  %v1372_v59 = vmov 0  }
 0x127   :  { %v401_v1 = vmul.f32 %v399_v62, %v393_v61 }
 0x129   :  { %v402_v2 = vpack.c.bf16 %v401_v1, %v400_v63 }
 0x12b   :  { %1166 = vmatmul.mubr.bf16.vlgmr.msra.gmra.mxu0 %v402_v2 }
 0x12c   :  { %842 = vmatpush1.bf16.msra.mxu0 %v1241_v10  ;;  %873 = vmatprep.mubr.bf16.mxu0 %v1372_v59 }
 0x12d   :  { %843 = vmatprep.subr.bf16.mxu0 %v1249_v31 }
 0x130   :  { %844 = vmatpush1.bf16.msra.mxu0 %v1247_v33 }
 0x131   :  { %845 = vmatprep.subr.bf16.mxu0 %v1255_v35 }
 0x134   :  { %846 = vmatpush1.bf16.msra.mxu0 %v1253_v37 }
 0x135   :  { %847 = vmatprep.subr.bf16.mxu0 %v1261_v39 }
 0x138   :  { %848 = vmatpush1.bf16.msra.mxu0 %v1259_v41 }
 0x139   :  { %849 = vmatprep.subr.bf16.mxu0 %v1267_v43 }
 0x13c   :  { %850 = vmatpush1.bf16.msra.mxu0 %v1265_v45 }
 0x13d   :  { %851 = vmatprep.subr.bf16.mxu0 %v1273_v47 }
 0x140   :  { %852 = vmatpush1.bf16.msra.mxu0 %v1271_v49 }
 0x141   :  { %853 = vmatprep.subr.bf16.mxu0 %v1279_v51 }
 0x144   :  { %854 = vmatpush1.bf16.msra.mxu0 %v1277_v53 }
 0x145   :  { %855 = vmatprep.subr.bf16.mxu0 %v1285_v55 }
 0x148   :  { %856 = vmatpush1.bf16.msra.mxu0 %v1283_v57 }
 0x1eb   :  { %v508_v13 = vpop.f32.mrf.mxu0 }
 0x1ec   :  { %v509_v14 = vadd.f32 %v1030_v0, %v508_v13 }
 0x1ed   :  { %v1167_v15 = vpop.f32.mrf.mxu0 }
 0x1ee   :  { %v517_v16 = vmul.f32 0.70710677, %v509_v14  ;;  %v515_v24 = vmul.f32 0.5, %v509_v14  ;;  %v929_v14 = vlaneseq }
 0x1ef   :  { %v511_v17 = vpop.f32.mrf.mxu0 }
 0x1f0   :  { %1293 = verf.f32 %v517_v16  ;;  %v512_v18 = vadd.f32 %v1030_v0, %v511_v17  ;;  %v930_v15 = vshrl.u32 %v929_v14, 7 }
 0x1f1   :  { %v1168_v19 = vpop.f32.mrf.mxu0 }
 0x1f2   :  { %v518_v20 = vmul.f32 0.70710677, %v512_v18  ;;  %v516_v25 = vmul.f32 0.5, %v512_v18  ;;  %v931_v16 = vsub.s32 0, %v930_v15  ;;  %v939_v17 = vsub.s32 2, %v930_v15 }
 0x1f3   :  { %v927_v18 = vld [vmem:[%s1628_s9] sm:$0xf]  ;;  %v935_v19 = vsub.s32 1, %v930_v15 }
 0x1f4   :  { %1295 = verf.f32 %v518_v20  ;;  %v943_v20 = vsub.s32 3, %v930_v15 }
 0x1fd   :  { %v1294_v21 = vpop.eup %1293 }
 0x1fe   :  { %v521_v22 = vadd.f32 1.0, %v1294_v21  ;;  %v957_v21 = vld [vmem:[%s1629_s10] sm:$0xf] }
 0x1ff   :  { %v974_v33 = vrot.slane %v957_v21, %v943_v20 }
 0x200   :  { %v523_v27 = vmul.f32 %v521_v22, %v515_v24  ;;  %v932_v22 = vrot.slane %v927_v18, %v931_v16  ;;  %v962_v24 = vrot.slane %v957_v21, %v931_v16 }
 0x201   :  { %v1296_v23 = vpop.eup %1295 }
 0x202   :  { %v522_v26 = vadd.f32 1.0, %v1296_v23  ;;  %v940_v23 = vrot.slane %v927_v18, %v939_v17 }
 0x204   :  { %v524_v28 = vmul.f32 %v522_v26, %v516_v25  ;;  %v970_v25 = vrot.slane %v957_v21, %v939_v17  ;;  %v936_v26 = vrot.slane %v927_v18, %v935_v19 }
 0x206   :  { %v525_v30 = vpack.c.bf16 %v524_v28, %v523_v27  ;;  %v944_v27 = vrot.slane %v927_v18, %v943_v20 }
 0x208   :  { %1186 = vmatmul.mubr.bf16.vlgmr.msra.gmra.mxu1 %v525_v30 }
 0x209   :  { %885 = vmatpush1.bf16.msra.mxu1 %v1244_v29  ;;  %916 = vmatprep.mubr.bf16.mxu1 %v1372_v59 }
 0x20a   :  { %886 = vmatprep.subr.bf16.mxu1 %v1252_v32  ;;  %v966_v32 = vrot.slane %v957_v21, %v935_v19 }
 0x20d   :  { %887 = vmatpush1.bf16.msra.mxu1 %v1250_v34 }
 0x20e   :  { %888 = vmatprep.subr.bf16.mxu1 %v1258_v36 }
 0x211   :  { %889 = vmatpush1.bf16.msra.mxu1 %v1256_v38 }
 0x212   :  { %890 = vmatprep.subr.bf16.mxu1 %v1264_v40 }
 0x215   :  { %891 = vmatpush1.bf16.msra.mxu1 %v1262_v42 }
 0x216   :  { %892 = vmatprep.subr.bf16.mxu1 %v1270_v44 }
 0x219   :  { %893 = vmatpush1.bf16.msra.mxu1 %v1268_v46 }
 0x21a   :  { %894 = vmatprep.subr.bf16.mxu1 %v1276_v48 }
 0x21d   :  { %895 = vmatpush1.bf16.msra.mxu1 %v1274_v50 }
 0x21e   :  { %896 = vmatprep.subr.bf16.mxu1 %v1282_v52 }
 0x221   :  { %897 = vmatpush1.bf16.msra.mxu1 %v1280_v54 }
 0x222   :  { %898 = vmatprep.subr.bf16.mxu1 %v1288_v56 }
 0x225   :  { %899 = vmatpush1.bf16.msra.mxu1 %v1286_v58 }
 0x2c8   :  { %v631_v61 = vpop.f32.mrf.mxu1 }
 0x2c9   :  { %v632_v62 = vadd.f32 %v1039_v60, %v631_v61 }
 0x2ca   :  { %v1187_v63 = vpop.f32.mrf.mxu1 }
 0x2cb   :  { %v640_v1 = vmul.f32 0.70710677, %v632_v62  ;;  %v638_v9 = vmul.f32 0.5, %v632_v62 }
 0x2cc   :  { %v634_v2 = vpop.f32.mrf.mxu1 }
 0x2cd   :  { %1297 = verf.f32 %v640_v1  ;;  %v635_v3 = vadd.f32 %v1039_v60, %v634_v2 }
 0x2ce   :  { %v1188_v4 = vpop.f32.mrf.mxu1 }
 0x2cf   :  { %v641_v5 = vmul.f32 0.70710677, %v635_v3  ;;  %v639_v10 = vmul.f32 0.5, %v635_v3 }
 0x2d1   :  { %1299 = verf.f32 %v641_v5 }
 0x2da   :  { %v1298_v6 = vpop.eup %1297 }
 0x2db   :  { %v644_v7 = vadd.f32 1.0, %v1298_v6 }
 0x2dd   :  { %v646_v12 = vmul.f32 %v644_v7, %v638_v9 }
 0x2de   :  { %v1300_v8 = vpop.eup %1299 }
 0x2df   :  { %v645_v11 = vadd.f32 1.0, %v1300_v8 }
 0x2e1   :  { %v647_v0 = vmul.f32 %v645_v11, %v639_v10 }
 0x2e3   :  { %v648_v13 = vpack.c.bf16 %v647_v0, %v646_v12 }
 0x2e5   :  { %874 = vmatmul.mubr.bf16.vlgmr.msra.gmra.mxu0 %v648_v13  ;;  %917 = vmatmul.mubr.bf16.vlgmr.msra.gmra.mxu1 %v648_v13 }
 0x3a5   :  { %v875_v28 = vpop.f32.mrf.mxu0  ;;  %v918_v29 = vpop.f32.mrf.mxu1 }
 0x3a6   :  { %v949_v30 = vmul.f32 %v932_v22, %v875_v28  ;;  %v951_v31 = vmul.f32 %v940_v23, %v918_v29 }
 0x3a7   :  { %v877_v34 = vpop.f32.mrf.mxu0  ;;  %v920_v35 = vpop.f32.mrf.mxu1 }
 0x3a8   :  { %v979_v36 = vadd.f32 %v962_v24, %v949_v30  ;;  %v981_v37 = vadd.f32 %v970_v25, %v951_v31  ;;  %v950_v38 = vmul.f32 %v936_v26, %v877_v34  ;;  %v952_v39 = vmul.f32 %v944_v27, %v920_v35 }
 0x3a9   :  { %v879_v40 = vpop.f32.mrf.mxu0  ;;  %v922_v41 = vpop.f32.mrf.mxu1 }
 0x3aa   :  { %987 = vst [vmem:[%s1630_s11] sm:$0xff] %v979_v36  ;;  %989 = vst [vmem:[%s1630_s11 + $0x10] sm:$0xff] %v981_v37  ;;  %v980_v42 = vadd.f32 %v966_v32, %v950_v38  ;;  %v982_v43 = vadd.f32 %v974_v33, %v952_v39  ;;  %v953_v44 = vmul.f32 %v932_v22, %v879_v40 }
 0x3ab   :  { %v955_v45 = vmul.f32 %v940_v23, %v922_v41  ;;  %v881_v46 = vpop.f32.mrf.mxu0  ;;  %v924_v47 = vpop.f32.mrf.mxu1 }
 0x3ac   :  { %988 = vst [vmem:[%s1630_s11 + $0x8] sm:$0xff] %v980_v42  ;;  %990 = vst [vmem:[%s1630_s11 + $0x18] sm:$0xff] %v982_v43  ;;  %v983_v48 = vadd.f32 %v962_v24, %v953_v44  ;;  %v954_v50 = vmul.f32 %v936_v26, %v881_v46  ;;  %v956_v51 = vmul.f32 %v944_v27, %v924_v47 }
 0x3ad   :  { %v985_v49 = vadd.f32 %v970_v25, %v955_v45 }
 0x3ae   :  { %991 = vst [vmem:[%s1630_s11 + $0x20] sm:$0xff] %v983_v48  ;;  %v984_v52 = vadd.f32 %v966_v32, %v954_v50  ;;  %v986_v53 = vadd.f32 %v974_v33, %v956_v51 }
 0x3af   :  { %993 = vst [vmem:[%s1630_s11 + $0x30] sm:$0xff] %v985_v49 }
 0x3b0   :  { %992 = vst [vmem:[%s1630_s11 + $0x28] sm:$0xff] %v984_v52  ;;  %994 = vst [vmem:[%s1630_s11 + $0x38] sm:$0xff] %v986_v53 }
 0x3b1   :  { %999 = vsyncpa [#allocation3], 1 }
 0x3b2   :  { %1000 = vsyncpa [#allocation5], 1 }

</bundles_post_ra>
